<compile_context>
chip_gen: v6e
topology: v6e:2x2x1
jax: 0.10.0
libtpu: 0.0.40
codegen_flags: <defaults>
</compile_context>

<pallas_src>
import functools
import math

import jax
import jax.numpy as jnp
from jax.experimental import pallas as pl
from jax.experimental.pallas import tpu as pltpu


def create_sinusoidal_positions(num_pos, dim):
    inv_freq = 1.0 / (10000.0 ** (jnp.arange(0, dim, 2, dtype=jnp.float32) / dim))
    sinusoid = jnp.einsum("i,j->ij", jnp.arange(num_pos, dtype=jnp.float32), inv_freq)
    return jnp.concatenate([jnp.sin(sinusoid), jnp.cos(sinusoid)], axis=1)  # (num_pos, dim)


# --------------------------------------------------------------------------- #
# Kernel 1: fused QKV projection + RoPE (+ 1/sqrt(d) folded into q).
# grid = (B, S // TS); every step is independent -> both axes "parallel".
# --------------------------------------------------------------------------- #
def _qkv_rope_kernel(x_ref, wq_ref, wk_ref, wv_ref, bq_ref, bk_ref, bv_ref,
                     cos_ref, sin_ref, q_ref, k_ref, v_ref,
                     *, num_heads, kv_channels, q_scale):
    d = kv_channels
    x = x_ref[0]                                             # (TS, H) bf16

    q = jnp.dot(x, wq_ref[...], preferred_element_type=jnp.float32) + bq_ref[...]
    k = jnp.dot(x, wk_ref[...], preferred_element_type=jnp.float32) + bk_ref[...]
    v = jnp.dot(x, wv_ref[...], preferred_element_type=jnp.float32) + bv_ref[...]

    cos = cos_ref[0]                                         # (TS, d) f32
    sin = sin_ref[0]                                         # (TS, d) f32

    def rope(t):                                             # (TS, d) f32
        rot = jnp.concatenate([-t[:, d // 2:], t[:, :d // 2]], axis=-1)  # rotate_half
        return t * cos + rot * sin

    # Static head loop with 128-aligned lane slices (demo nh=2).
    # TODO(synk): for nh >= 8 switch to lax.fori_loop + pl.ds to bound live ranges.
    for h in range(num_heads):
        lo = h * d
        q_ref[0, :, lo:lo + d] = (rope(q[:, lo:lo + d]) * q_scale).astype(q_ref.dtype)
        k_ref[0, :, lo:lo + d] = rope(k[:, lo:lo + d]).astype(k_ref.dtype)
    v_ref[0] = v.astype(v_ref.dtype)


# --------------------------------------------------------------------------- #
# Kernel 2: flash attention (online softmax over KV tiles) + fused out-proj.
# grid = (B, S // TQ, S // TK); KV axis is the reduction ("arbitrary").
# --------------------------------------------------------------------------- #
def _flash_attn_kernel(q_ref, k_ref, v_ref, mask_ref, wo_ref, bo_ref, out_ref,
                       m_ref, l_ref, acc_ref, *, num_heads, kv_channels):
    d = kv_channels
    ki = pl.program_id(2)

    @pl.when(ki == 0)
    def _init():
        m_ref[...] = jnp.full_like(m_ref, -jnp.inf)
        l_ref[...] = jnp.zeros_like(l_ref)
        acc_ref[...] = jnp.zeros_like(acc_ref)

    q = q_ref[0]                                             # (TQ, P) bf16, pre-scaled
    k = k_ref[0]                                             # (TK, P) bf16
    v = v_ref[0]                                             # (TK, P) bf16
    mask = mask_ref[0]                                       # (TQ, TK) bf16, 1.0 == masked
    neg_fill = jnp.float32(-10000.0)

    for h in range(num_heads):
        lo = h * d
        # scores = q_h @ k_h^T (q already carries 1/sqrt(d)); contract last dims.
        s = jax.lax.dot_general(q[:, lo:lo + d], k[:, lo:lo + d],
                                (((1,), (1,)), ((), ())),
                                preferred_element_type=jnp.float32)       # (TQ, TK)
        s = jnp.where(mask > 0, neg_fill, s)                 # masked_fill semantics

        m_prev = m_ref[h]                                    # (TQ, 1)
        m_cur = jnp.maximum(m_prev, jnp.max(s, axis=-1, keepdims=True))
        alpha = jnp.exp(m_prev - m_cur)
        p = jnp.exp(s - m_cur)
        l_ref[h] = alpha * l_ref[h] + jnp.sum(p, axis=-1, keepdims=True)
        acc_ref[:, lo:lo + d] = alpha * acc_ref[:, lo:lo + d] + jnp.dot(
            p.astype(v.dtype), v[:, lo:lo + d], preferred_element_type=jnp.float32)
        m_ref[h] = m_cur

    @pl.when(ki == pl.num_programs(2) - 1)
    def _finalize():
        # Normalize per head, then ONE (TQ,P) @ (P,H) output projection (K=P >= 256).
        inv_l = 1.0 / l_ref[...]                             # (nh, TQ, 1) f32
        parts = [acc_ref[:, h * d:(h + 1) * d] * inv_l[h] for h in range(num_heads)]
        ctx = jnp.concatenate(parts, axis=-1).astype(jnp.bfloat16)        # (TQ, P)
        out = jnp.dot(ctx, wo_ref[...], preferred_element_type=jnp.float32) + bo_ref[...]
        out_ref[0] = out.astype(out_ref.dtype)
        # TODO(synk): training-mode attention dropout and layer_head_mask not applied
        #             (module is exercised in eval mode).


# --------------------------------------------------------------------------- #
# Helpers
# --------------------------------------------------------------------------- #
def _pick_tile(dim, target, mult):
    """Largest divisor of `dim` that is <= target and a multiple of `mult`;
    falls back to the full dim (always a legal block size)."""
    if dim <= target:
        return dim
    t = (target // mult) * mult
    while t >= mult:
        if dim % t == 0:
            return t
        t -= mult
    return dim


def _vmem_cap_bytes():
    try:
        return int(pltpu.get_tpu_info().vmem_capacity_bytes)   # 128 MiB v5e/v6e, 64 MiB v7x
    except Exception:
        return 64 << 20                                         # conservative fallback


def _clamp_vmem(est_bytes):
    est = int(est_bytes * 1.5) + (4 << 20)                      # headroom
    return max(16 << 20, min(_vmem_cap_bytes(), est))


# --------------------------------------------------------------------------- #
# Wrapper
# --------------------------------------------------------------------------- #
def openba_self_attention(hidden_states, w_qkv, b_qkv, w_o, b_o,
                          rotary_embedding, position_ids, attention_mask,
                          *, num_heads, kv_channels):
    """Self-attention forward (eval mode, no KV cache).

    hidden_states: (B, S, H) f32;  w_qkv: (3P, H), b_qkv: (3P,)  [PyTorch layout]
    w_o: (H, P), b_o: (H,);  rotary_embedding: (max_pos, d);
    position_ids: (B, S) int32;  attention_mask: (B, S, S) bool, True == masked.
    """
    B, S, H = hidden_states.shape
    d = kv_channels
    P = num_heads * d
    assert w_qkv.shape == (3 * P, H) and w_o.shape == (H, P)

    bf16 = jnp.bfloat16

    # Split packed QKV weight so heads are contiguous along the output dim:
    # column h*d + c of wq is row h*3d + c of w_qkv (matches view(nh,3d)+chunk).
    w4 = w_qkv.reshape(num_heads, 3, d, H)
    wq = jnp.transpose(w4[:, 0], (2, 0, 1)).reshape(H, P).astype(bf16)
    wk = jnp.transpose(w4[:, 1], (2, 0, 1)).reshape(H, P).astype(bf16)
    wv = jnp.transpose(w4[:, 2], (2, 0, 1)).reshape(H, P).astype(bf16)
    b4 = b_qkv.reshape(num_heads, 3, d)
    bq = b4[:, 0].reshape(1, P).astype(jnp.float32)
    bk = b4[:, 1].reshape(1, P).astype(jnp.float32)
    bv = b4[:, 2].reshape(1, P).astype(jnp.float32)

    wo_t = jnp.transpose(w_o).astype(bf16)                    # (P, H)
    bo = b_o.reshape(1, H).astype(jnp.float32)

    # RoPE tables gathered per position (tiny gather stays in the wrapper).
    sincos = jnp.take(rotary_embedding, position_ids, axis=0)            # (B, S, d)
    sin_h, cos_h = jnp.split(sincos.astype(jnp.float32), 2, axis=-1)
    cos = jnp.concatenate([cos_h, cos_h], axis=-1)                        # (B, S, d)
    sin = jnp.concatenate([sin_h, sin_h], axis=-1)                        # (B, S, d)

    mask_bf = attention_mask.astype(bf16)                     # half the bytes of f32
    x_bf = hidden_states.astype(bf16)

    # Tile sizes (full dim is always a legal block size for small S).
    TS = _pick_tile(S, 256, 8)       # seq tile for projection kernel
    TQ = _pick_tile(S, 256, 8)       # query tile
    TK = _pick_tile(S, 512, 128)     # kv tile (lane-aligned mask blocks)

    full2 = lambda *_: (0, 0)

    # ---------------- kernel 1: QKV projection + RoPE ----------------
    proj_kernel = functools.partial(_qkv_rope_kernel, num_heads=num_heads,
                                    kv_channels=d, q_scale=float(1.0 / math.sqrt(d)))
    seq_blk = lambda b, si: (b, si, 0)

    est1 = (2 * (TS * H * 2 + 3 * TS * P * 2 + 2 * TS * d * 4)   # streamed, double-buffered
            + 2 * (3 * H * P * 2 + 3 * P * 4)                    # resident weights/biases
            + 3 * TS * P * 4 + 2 * TS * d * 4)                   # f32 temporaries

    q_p, k_p, v_p = pl.pallas_call(
        proj_kernel,
        out_shape=(jax.ShapeDtypeStruct((B, S, P), bf16),
                   jax.ShapeDtypeStruct((B, S, P), bf16),
                   jax.ShapeDtypeStruct((B, S, P), bf16)),
        grid_spec=pltpu.PrefetchScalarGridSpec(
            num_scalar_prefetch=0,
            grid=(B, S // TS),
            in_specs=[
                pl.BlockSpec((1, TS, H), seq_blk),    # x (bf16)
                pl.BlockSpec((H, P), full2),          # W_q^T (resident)
                pl.BlockSpec((H, P), full2),          # W_k^T (resident)
                pl.BlockSpec((H, P), full2),          # W_v^T (resident)
                pl.BlockSpec((1, P), full2),          # b_q
                pl.BlockSpec((1, P), full2),          # b_k
                pl.BlockSpec((1, P), full2),          # b_v
                pl.BlockSpec((1, TS, d), seq_blk),    # cos
                pl.BlockSpec((1, TS, d), seq_blk),    # sin
            ],
            out_specs=[pl.BlockSpec((1, TS, P), seq_blk)] * 3,
        ),
        compiler_params=pltpu.CompilerParams(
            dimension_semantics=("parallel", "parallel"),
            vmem_limit_bytes=_clamp_vmem(est1)),
    )(x_bf, wq, wk, wv, bq, bk, bv, cos, sin)

    # ---------------- kernel 2: flash attention + output projection ----------------
    attn_kernel = functools.partial(_flash_attn_kernel, num_heads=num_heads, kv_channels=d)

    q_blk = lambda b, qi, ki: (b, qi, 0)
    kv_blk = lambda b, qi, ki: (b, ki, 0)
    msk_blk = lambda b, qi, ki: (b, qi, ki)

    est2 = (2 * (TQ * P * 2 + 2 * TK * P * 2 + TQ * TK * 2 + TQ * H * 2)  # streamed blocks
            + 2 * (P * H * 2 + H * 4)                                      # resident W_o, b_o
            + TQ * P * 4 + 2 * num_heads * TQ * 4                          # scratch
            + 4 * TQ * TK * 4 + TQ * H * 4)                                # f32 temporaries

    out = pl.pallas_call(
        attn_kernel,
        out_shape=jax.ShapeDtypeStruct((B, S, H), hidden_states.dtype),
        grid_spec=pltpu.PrefetchScalarGridSpec(
            num_scalar_prefetch=0,
            grid=(B, S // TQ, S // TK),
            in_specs=[
                pl.BlockSpec((1, TQ, P), q_blk),      # q (bf16, pre-scaled)
                pl.BlockSpec((1, TK, P), kv_blk),     # k (bf16)
                pl.BlockSpec((1, TK, P), kv_blk),     # v (bf16)
                pl.BlockSpec((1, TQ, TK), msk_blk),   # mask (bf16, 1.0 == masked)
                pl.BlockSpec((P, H), full2),          # W_o^T (resident)
                pl.BlockSpec((1, H), full2),          # b_o
            ],
            out_specs=pl.BlockSpec((1, TQ, H), q_blk),
            scratch_shapes=[
                pltpu.VMEM((num_heads, TQ, 1), jnp.float32),   # running max  m
                pltpu.VMEM((num_heads, TQ, 1), jnp.float32),   # running sum  l
                pltpu.VMEM((TQ, P), jnp.float32),              # ctx accumulator
            ],
        ),
        compiler_params=pltpu.CompilerParams(
            dimension_semantics=("parallel", "parallel", "arbitrary"),
            vmem_limit_bytes=_clamp_vmem(est2)),
    )(q_p, k_p, v_p, mask_bf, wo_t, bo)

    # TODO(synk): cross-attention branch, past_key_value/use_cache concat and
    #             output_attentions of the PyTorch module are not implemented.
    return out


# --------------------------------------------------------------------------- #
# Pure-JAX reference (mirrors the PyTorch module, f32 everywhere)
# --------------------------------------------------------------------------- #
def _reference(x, w_qkv, b_qkv, w_o, b_o, rotary, position_ids, mask,
               num_heads, kv_channels):
    B, S, H = x.shape
    d = kv_channels
    mixed = jnp.einsum("bsh,ph->bsp", x, w_qkv) + b_qkv
    mixed = mixed.reshape(B, S, num_heads, 3 * d)
    q, k, v = jnp.split(mixed, 3, axis=-1)
    sincos = rotary[position_ids]
    sin_h, cos_h = jnp.split(sincos, 2, axis=-1)
    sin = jnp.concatenate([sin_h, sin_h], -1)[:, :, None, :]
    cos = jnp.concatenate([cos_h, cos_h], -1)[:, :, None, :]

    def rot_half(t):
        t1, t2 = t[..., : d // 2], t[..., d // 2:]
        return jnp.concatenate([-t2, t1], -1)

    q = q * cos + rot_half(q) * sin
    k = k * cos + rot_half(k) * sin
    q = jnp.transpose(q, (0, 2, 1, 3))
    k = jnp.transpose(k, (0, 2, 1, 3))
    v = jnp.transpose(v, (0, 2, 1, 3))
    scores = jnp.einsum("bhqd,bhkd->bhqk", q, k) / jnp.sqrt(jnp.float32(d))
    scores = jnp.where(mask[:, None, :, :], -10000.0, scores)
    w = jax.nn.softmax(scores, axis=-1)
    ctx = jnp.einsum("bhqk,bhkd->bhqd", w, v)
    ctx = jnp.transpose(ctx, (0, 2, 1, 3)).reshape(B, S, num_heads * d)
    return jnp.einsum("bsp,hp->bsh", ctx, w_o) + b_o


if __name__ == "__main__":
    # Small config consistent with the module: hidden 256, 2 heads x 128 channels.
    hidden_size = 256
    num_heads = 2
    kv_channels = 128
    max_seq_length = 64
    batch, seq = 2, 16
    proj = num_heads * kv_channels

    key = jax.random.PRNGKey(0)
    kx, kw1, kb1, kw2, kb2 = jax.random.split(key, 5)

    x = jax.random.normal(kx, (batch, seq, hidden_size), dtype=jnp.float32)
    w_qkv = 0.02 * jax.random.normal(kw1, (3 * proj, hidden_size), dtype=jnp.float32)
    b_qkv = 0.01 * jax.random.normal(kb1, (3 * proj,), dtype=jnp.float32)
    w_o = 0.02 * jax.random.normal(kw2, (hidden_size, proj), dtype=jnp.float32)
    b_o = 0.01 * jax.random.normal(kb2, (hidden_size,), dtype=jnp.float32)

    rotary = create_sinusoidal_positions(max_seq_length, kv_channels)
    position_ids = jnp.broadcast_to(jnp.arange(seq, dtype=jnp.int32), (batch, seq))
    causal = jnp.triu(jnp.ones((seq, seq), dtype=bool), k=1)   # True == masked
    attn_mask = jnp.broadcast_to(causal, (batch, seq, seq))

    y = openba_self_attention(x, w_qkv, b_qkv, w_o, b_o, rotary,
                              position_ids, attn_mask,
                              num_heads=num_heads, kv_channels=kv_channels)
    y = jax.block_until_ready(y)

    y_ref = _reference(x, w_qkv, b_qkv, w_o, b_o, rotary, position_ids,
                       attn_mask, num_heads, kv_channels)
    assert y.shape == (batch, seq, hidden_size)
    # Tolerance loosened vs the f32 reference because MXU inputs are bf16 (f32 accum).
    max_err = float(jnp.max(jnp.abs(y - y_ref)))
    assert jnp.allclose(y, y_ref, atol=5e-3, rtol=3e-2), f"mismatch, max abs err={max_err}"

    print("KERNEL_OK")
</pallas_src>

<mosaic_0001>
module attributes {stable_mosaic.version = 11 : i64} {
  func.func @_qkv_rope_kernel(%arg0: i32, %arg1: i32, %arg2: memref<1x16x256xbf16, #tpu.memory_space<vmem>>, %arg3: memref<256x256xbf16, #tpu.memory_space<vmem>>, %arg4: memref<256x256xbf16, #tpu.memory_space<vmem>>, %arg5: memref<256x256xbf16, #tpu.memory_space<vmem>>, %arg6: memref<1x256xf32, #tpu.memory_space<vmem>>, %arg7: memref<1x256xf32, #tpu.memory_space<vmem>>, %arg8: memref<1x256xf32, #tpu.memory_space<vmem>>, %arg9: memref<1x16x128xf32, #tpu.memory_space<vmem>>, %arg10: memref<1x16x128xf32, #tpu.memory_space<vmem>>, %arg11: memref<1x16x256xbf16, #tpu.memory_space<vmem>>, %arg12: memref<1x16x256xbf16, #tpu.memory_space<vmem>>, %arg13: memref<1x16x256xbf16, #tpu.memory_space<vmem>>) attributes {dimension_semantics = [#tpu.dimension_semantics<parallel>, #tpu.dimension_semantics<parallel>], iteration_bounds = array<i64: 2, 1>, scalar_prefetch = 0 : i64, scratch_operands = 0 : i64, tpu.core_type = #tpu.core_type<tc>, window_params = [{transform_indices = @transform_0, window_bounds = array<i64: 1, 16, 256>}, {pipeline_mode = #tpu.pipeline_mode<synchronous>, transform_indices = @transform_1, window_bounds = array<i64: 256, 256>}, {pipeline_mode = #tpu.pipeline_mode<synchronous>, transform_indices = @transform_2, window_bounds = array<i64: 256, 256>}, {pipeline_mode = #tpu.pipeline_mode<synchronous>, transform_indices = @transform_3, window_bounds = array<i64: 256, 256>}, {pipeline_mode = #tpu.pipeline_mode<synchronous>, transform_indices = @transform_4, window_bounds = array<i64: 1, 256>}, {pipeline_mode = #tpu.pipeline_mode<synchronous>, transform_indices = @transform_5, window_bounds = array<i64: 1, 256>}, {pipeline_mode = #tpu.pipeline_mode<synchronous>, transform_indices = @transform_6, window_bounds = array<i64: 1, 256>}, {transform_indices = @transform_7, window_bounds = array<i64: 1, 16, 128>}, {transform_indices = @transform_8, window_bounds = array<i64: 1, 16, 128>}, {transform_indices = @transform_9, window_bounds = array<i64: 1, 16, 256>}, {transform_indices = @transform_10, window_bounds = array<i64: 1, 16, 256>}, {transform_indices = @transform_11, window_bounds = array<i64: 1, 16, 256>}]} {
    %c0 = arith.constant 0 : index
    %c0_0 = arith.constant 0 : index
    %c0_1 = arith.constant 0 : index
    %0 = vector.load %arg2[%c0, %c0_0, %c0_1] : memref<1x16x256xbf16, #tpu.memory_space<vmem>>, vector<1x16x256xbf16>
    %1 = vector.shape_cast %0 : vector<1x16x256xbf16> to vector<16x256xbf16>
    %c0_2 = arith.constant 0 : index
    %c0_3 = arith.constant 0 : index
    %2 = vector.load %arg3[%c0_2, %c0_3] : memref<256x256xbf16, #tpu.memory_space<vmem>>, vector<256x256xbf16>
    %cst = arith.constant dense<0.000000e+00> : vector<16x256xf32>
    %3 = tpu.matmul %1, %2, %cst {dimension_numbers = #tpu.dot_dimension_numbers<[1], [0], [0], [1], [0, 0, 1, 1], [], []>} : vector<16x256xbf16>, vector<256x256xbf16>, vector<16x256xf32> -> vector<16x256xf32>
    %c0_4 = arith.constant 0 : index
    %c0_5 = arith.constant 0 : index
    %4 = vector.load %arg6[%c0_4, %c0_5] : memref<1x256xf32, #tpu.memory_space<vmem>>, vector<1x256xf32>
    %5 = vector.broadcast %4 : vector<1x256xf32> to vector<16x256xf32>
    %6 = arith.addf %3, %5 : vector<16x256xf32>
    %c0_6 = arith.constant 0 : index
    %c0_7 = arith.constant 0 : index
    %7 = vector.load %arg4[%c0_6, %c0_7] : memref<256x256xbf16, #tpu.memory_space<vmem>>, vector<256x256xbf16>
    %cst_8 = arith.constant dense<0.000000e+00> : vector<16x256xf32>
    %8 = tpu.matmul %1, %7, %cst_8 {dimension_numbers = #tpu.dot_dimension_numbers<[1], [0], [0], [1], [0, 0, 1, 1], [], []>} : vector<16x256xbf16>, vector<256x256xbf16>, vector<16x256xf32> -> vector<16x256xf32>
    %c0_9 = arith.constant 0 : index
    %c0_10 = arith.constant 0 : index
    %9 = vector.load %arg7[%c0_9, %c0_10] : memref<1x256xf32, #tpu.memory_space<vmem>>, vector<1x256xf32>
    %10 = vector.broadcast %9 : vector<1x256xf32> to vector<16x256xf32>
    %11 = arith.addf %8, %10 : vector<16x256xf32>
    %c0_11 = arith.constant 0 : index
    %c0_12 = arith.constant 0 : index
    %12 = vector.load %arg5[%c0_11, %c0_12] : memref<256x256xbf16, #tpu.memory_space<vmem>>, vector<256x256xbf16>
    %cst_13 = arith.constant dense<0.000000e+00> : vector<16x256xf32>
    %13 = tpu.matmul %1, %12, %cst_13 {dimension_numbers = #tpu.dot_dimension_numbers<[1], [0], [0], [1], [0, 0, 1, 1], [], []>} : vector<16x256xbf16>, vector<256x256xbf16>, vector<16x256xf32> -> vector<16x256xf32>
    %c0_14 = arith.constant 0 : index
    %c0_15 = arith.constant 0 : index
    %14 = vector.load %arg8[%c0_14, %c0_15] : memref<1x256xf32, #tpu.memory_space<vmem>>, vector<1x256xf32>
    %15 = vector.broadcast %14 : vector<1x256xf32> to vector<16x256xf32>
    %16 = arith.addf %13, %15 : vector<16x256xf32>
    %c0_16 = arith.constant 0 : index
    %c0_17 = arith.constant 0 : index
    %c0_18 = arith.constant 0 : index
    %17 = vector.load %arg9[%c0_16, %c0_17, %c0_18] : memref<1x16x128xf32, #tpu.memory_space<vmem>>, vector<1x16x128xf32>
    %18 = vector.shape_cast %17 : vector<1x16x128xf32> to vector<16x128xf32>
    %c0_19 = arith.constant 0 : index
    %c0_20 = arith.constant 0 : index
    %c0_21 = arith.constant 0 : index
    %19 = vector.load %arg10[%c0_19, %c0_20, %c0_21] : memref<1x16x128xf32, #tpu.memory_space<vmem>>, vector<1x16x128xf32>
    %20 = vector.shape_cast %19 : vector<1x16x128xf32> to vector<16x128xf32>
    %21 = vector.extract_strided_slice %6 {offsets = [0, 0], sizes = [16, 128], strides = [1, 1]} : vector<16x256xf32> to vector<16x128xf32>
    %22 = vector.extract_strided_slice %21 {offsets = [0, 64], sizes = [16, 64], strides = [1, 1]} : vector<16x128xf32> to vector<16x64xf32>
    %cst_22 = arith.constant 0.000000e+00 : f32
    %23 = vector.broadcast %cst_22 : f32 to vector<16x64xf32>
    %24 = arith.subf %23, %22 : vector<16x64xf32>
    %25 = vector.extract_strided_slice %21 {offsets = [0, 0], sizes = [16, 64], strides = [1, 1]} : vector<16x128xf32> to vector<16x64xf32>
    %26 = tpu.concatenate %24, %25 in 1 : vector<16x64xf32>, vector<16x64xf32> -> vector<16x128xf32>
    %27 = arith.mulf %21, %18 : vector<16x128xf32>
    %28 = arith.mulf %26, %20 : vector<16x128xf32>
    %29 = arith.addf %27, %28 : vector<16x128xf32>
    %cst_23 = arith.constant 0.0883883461 : f32
    %30 = vector.broadcast %cst_23 : f32 to vector<16x128xf32>
    %31 = arith.mulf %29, %30 : vector<16x128xf32>
    %32 = arith.truncf %31 : vector<16x128xf32> to vector<16x128xbf16>
    %c0_24 = arith.constant 0 : index
    %c0_25 = arith.constant 0 : index
    %c0_26 = arith.constant 0 : index
    %33 = vector.load %arg11[%c0_24, %c0_25, %c0_26] : memref<1x16x256xbf16, #tpu.memory_space<vmem>>, vector<1x16x128xbf16>
    %34 = vector.shape_cast %33 : vector<1x16x128xbf16> to vector<16x128xbf16>
    %35 = vector.shape_cast %32 : vector<16x128xbf16> to vector<1x16x128xbf16>
    tpu.vector_store %arg11[%c0_24, %c0_25, %c0_26], %35 {strides = array<i32>} : memref<1x16x256xbf16, #tpu.memory_space<vmem>>, vector<1x16x128xbf16>,
    %36 = vector.extract_strided_slice %11 {offsets = [0, 0], sizes = [16, 128], strides = [1, 1]} : vector<16x256xf32> to vector<16x128xf32>
    %37 = vector.extract_strided_slice %36 {offsets = [0, 64], sizes = [16, 64], strides = [1, 1]} : vector<16x128xf32> to vector<16x64xf32>
    %cst_27 = arith.constant 0.000000e+00 : f32
    %38 = vector.broadcast %cst_27 : f32 to vector<16x64xf32>
    %39 = arith.subf %38, %37 : vector<16x64xf32>
    %40 = vector.extract_strided_slice %36 {offsets = [0, 0], sizes = [16, 64], strides = [1, 1]} : vector<16x128xf32> to vector<16x64xf32>
    %41 = tpu.concatenate %39, %40 in 1 : vector<16x64xf32>, vector<16x64xf32> -> vector<16x128xf32>
    %42 = arith.mulf %36, %18 : vector<16x128xf32>
    %43 = arith.mulf %41, %20 : vector<16x128xf32>
    %44 = arith.addf %42, %43 : vector<16x128xf32>
    %45 = arith.truncf %44 : vector<16x128xf32> to vector<16x128xbf16>
    %c0_28 = arith.constant 0 : index
    %c0_29 = arith.constant 0 : index
    %c0_30 = arith.constant 0 : index
    %46 = vector.load %arg12[%c0_28, %c0_29, %c0_30] : memref<1x16x256xbf16, #tpu.memory_space<vmem>>, vector<1x16x128xbf16>
    %47 = vector.shape_cast %46 : vector<1x16x128xbf16> to vector<16x128xbf16>
    %48 = vector.shape_cast %45 : vector<16x128xbf16> to vector<1x16x128xbf16>
    tpu.vector_store %arg12[%c0_28, %c0_29, %c0_30], %48 {strides = array<i32>} : memref<1x16x256xbf16, #tpu.memory_space<vmem>>, vector<1x16x128xbf16>,
    %49 = vector.extract_strided_slice %6 {offsets = [0, 128], sizes = [16, 128], strides = [1, 1]} : vector<16x256xf32> to vector<16x128xf32>
    %50 = vector.extract_strided_slice %49 {offsets = [0, 64], sizes = [16, 64], strides = [1, 1]} : vector<16x128xf32> to vector<16x64xf32>
    %cst_31 = arith.constant 0.000000e+00 : f32
    %51 = vector.broadcast %cst_31 : f32 to vector<16x64xf32>
    %52 = arith.subf %51, %50 : vector<16x64xf32>
    %53 = vector.extract_strided_slice %49 {offsets = [0, 0], sizes = [16, 64], strides = [1, 1]} : vector<16x128xf32> to vector<16x64xf32>
    %54 = tpu.concatenate %52, %53 in 1 : vector<16x64xf32>, vector<16x64xf32> -> vector<16x128xf32>
    %55 = arith.mulf %49, %18 : vector<16x128xf32>
    %56 = arith.mulf %54, %20 : vector<16x128xf32>
    %57 = arith.addf %55, %56 : vector<16x128xf32>
    %cst_32 = arith.constant 0.0883883461 : f32
    %58 = vector.broadcast %cst_32 : f32 to vector<16x128xf32>
    %59 = arith.mulf %57, %58 : vector<16x128xf32>
    %60 = arith.truncf %59 : vector<16x128xf32> to vector<16x128xbf16>
    %c0_33 = arith.constant 0 : index
    %c0_34 = arith.constant 0 : index
    %c128 = arith.constant 128 : index
    %61 = vector.load %arg11[%c0_33, %c0_34, %c128] : memref<1x16x256xbf16, #tpu.memory_space<vmem>>, vector<1x16x128xbf16>
    %62 = vector.shape_cast %61 : vector<1x16x128xbf16> to vector<16x128xbf16>
    %63 = vector.shape_cast %60 : vector<16x128xbf16> to vector<1x16x128xbf16>
    tpu.vector_store %arg11[%c0_33, %c0_34, %c128], %63 {strides = array<i32>} : memref<1x16x256xbf16, #tpu.memory_space<vmem>>, vector<1x16x128xbf16>,
    %64 = vector.extract_strided_slice %11 {offsets = [0, 128], sizes = [16, 128], strides = [1, 1]} : vector<16x256xf32> to vector<16x128xf32>
    %65 = vector.extract_strided_slice %64 {offsets = [0, 64], sizes = [16, 64], strides = [1, 1]} : vector<16x128xf32> to vector<16x64xf32>
    %cst_35 = arith.constant 0.000000e+00 : f32
    %66 = vector.broadcast %cst_35 : f32 to vector<16x64xf32>
    %67 = arith.subf %66, %65 : vector<16x64xf32>
    %68 = vector.extract_strided_slice %64 {offsets = [0, 0], sizes = [16, 64], strides = [1, 1]} : vector<16x128xf32> to vector<16x64xf32>
    %69 = tpu.concatenate %67, %68 in 1 : vector<16x64xf32>, vector<16x64xf32> -> vector<16x128xf32>
    %70 = arith.mulf %64, %18 : vector<16x128xf32>
    %71 = arith.mulf %69, %20 : vector<16x128xf32>
    %72 = arith.addf %70, %71 : vector<16x128xf32>
    %73 = arith.truncf %72 : vector<16x128xf32> to vector<16x128xbf16>
    %c0_36 = arith.constant 0 : index
    %c0_37 = arith.constant 0 : index
    %c128_38 = arith.constant 128 : index
    %74 = vector.load %arg12[%c0_36, %c0_37, %c128_38] : memref<1x16x256xbf16, #tpu.memory_space<vmem>>, vector<1x16x128xbf16>
    %75 = vector.shape_cast %74 : vector<1x16x128xbf16> to vector<16x128xbf16>
    %76 = vector.shape_cast %73 : vector<16x128xbf16> to vector<1x16x128xbf16>
    tpu.vector_store %arg12[%c0_36, %c0_37, %c128_38], %76 {strides = array<i32>} : memref<1x16x256xbf16, #tpu.memory_space<vmem>>, vector<1x16x128xbf16>,
    %77 = arith.truncf %16 : vector<16x256xf32> to vector<16x256xbf16>
    %c0_39 = arith.constant 0 : index
    %c0_40 = arith.constant 0 : index
    %c0_41 = arith.constant 0 : index
    %78 = vector.load %arg13[%c0_39, %c0_40, %c0_41] : memref<1x16x256xbf16, #tpu.memory_space<vmem>>, vector<1x16x256xbf16>
    %79 = vector.shape_cast %78 : vector<1x16x256xbf16> to vector<16x256xbf16>
    %80 = vector.shape_cast %77 : vector<16x256xbf16> to vector<1x16x256xbf16>
    tpu.vector_store %arg13[%c0_39, %c0_40, %c0_41], %80 {strides = array<i32>} : memref<1x16x256xbf16, #tpu.memory_space<vmem>>, vector<1x16x256xbf16>,
    return
  }
  func.func @transform_0(%arg0: i32, %arg1: i32) -> (i32, i32, i32) {
    %c0_i32 = arith.constant 0 : i32
    %c0_i32_0 = arith.constant 0 : i32
    return %arg0, %arg1, %c0_i32 : i32, i32, i32
  }
  func.func @transform_1(%arg0: i32, %arg1: i32) -> (i32, i32) {
    %c0_i32 = arith.constant 0 : i32
    %c0_i32_0 = arith.constant 0 : i32
    %c0_i32_1 = arith.constant 0 : i32
    return %c0_i32, %c0_i32_0 : i32, i32
  }
  func.func @transform_2(%arg0: i32, %arg1: i32) -> (i32, i32) {
    %c0_i32 = arith.constant 0 : i32
    %c0_i32_0 = arith.constant 0 : i32
    %c0_i32_1 = arith.constant 0 : i32
    return %c0_i32, %c0_i32_0 : i32, i32
  }
  func.func @transform_3(%arg0: i32, %arg1: i32) -> (i32, i32) {
    %c0_i32 = arith.constant 0 : i32
    %c0_i32_0 = arith.constant 0 : i32
    %c0_i32_1 = arith.constant 0 : i32
    return %c0_i32, %c0_i32_0 : i32, i32
  }
  func.func @transform_4(%arg0: i32, %arg1: i32) -> (i32, i32) {
    %c0_i32 = arith.constant 0 : i32
    %c0_i32_0 = arith.constant 0 : i32
    %c0_i32_1 = arith.constant 0 : i32
    return %c0_i32, %c0_i32_0 : i32, i32
  }
  func.func @transform_5(%arg0: i32, %arg1: i32) -> (i32, i32) {
    %c0_i32 = arith.constant 0 : i32
    %c0_i32_0 = arith.constant 0 : i32
    %c0_i32_1 = arith.constant 0 : i32
    return %c0_i32, %c0_i32_0 : i32, i32
  }
  func.func @transform_6(%arg0: i32, %arg1: i32) -> (i32, i32) {
    %c0_i32 = arith.constant 0 : i32
    %c0_i32_0 = arith.constant 0 : i32
    %c0_i32_1 = arith.constant 0 : i32
    return %c0_i32, %c0_i32_0 : i32, i32
  }
  func.func @transform_7(%arg0: i32, %arg1: i32) -> (i32, i32, i32) {
    %c0_i32 = arith.constant 0 : i32
    %c0_i32_0 = arith.constant 0 : i32
    return %arg0, %arg1, %c0_i32 : i32, i32, i32
  }
  func.func @transform_8(%arg0: i32, %arg1: i32) -> (i32, i32, i32) {
    %c0_i32 = arith.constant 0 : i32
    %c0_i32_0 = arith.constant 0 : i32
    return %arg0, %arg1, %c0_i32 : i32, i32, i32
  }
  func.func @transform_9(%arg0: i32, %arg1: i32) -> (i32, i32, i32) {
    %c0_i32 = arith.constant 0 : i32
    %c0_i32_0 = arith.constant 0 : i32
    return %arg0, %arg1, %c0_i32 : i32, i32, i32
  }
  func.func @transform_10(%arg0: i32, %arg1: i32) -> (i32, i32, i32) {
    %c0_i32 = arith.constant 0 : i32
    %c0_i32_0 = arith.constant 0 : i32
    return %arg0, %arg1, %c0_i32 : i32, i32, i32
  }
  func.func @transform_11(%arg0: i32, %arg1: i32) -> (i32, i32, i32) {
    %c0_i32 = arith.constant 0 : i32
    %c0_i32_0 = arith.constant 0 : i32
    return %arg0, %arg1, %c0_i32 : i32, i32, i32
  }
}

</mosaic_0001>

<bundles_post_ra>
// kernel: tpu_custom_call.1
= control target key start
LH: loop header
LB: loop body
LE: loop exit
PB: predicated region body
PF: predicated region fallthrough
CT: control target
= control target key end

     0   :  { %s3079_s0 = inlined_call_operand.hbm [shape: bf16[2,16,256], index: 0, kind: input, shape index: {}]   ;;  %s3080_s1 = inlined_call_operand.hbm [shape: bf16[256,256], index: 1, kind: input, shape index: {}]   ;;  %s3081_s2 = inlined_call_operand.hbm [shape: bf16[256,256], index: 2, kind: input, shape index: {}]   ;;  %s3082_s3 = inlined_call_operand.hbm [shape: bf16[256,256], index: 3, kind: input, shape index: {}]   ;;  %s3083_s4 = inlined_call_operand.vmem [shape: f32[1,256], index: 4, kind: input, shape index: {}]   ;;  %s3084_s5 = inlined_call_operand.vmem [shape: f32[1,256], index: 5, kind: input, shape index: {}]   ;;  %s3085_s6 = inlined_call_operand.vmem [shape: f32[1,256], index: 6, kind: input, shape index: {}]   ;;  %s3086_s7 = inlined_call_operand.hbm [shape: f32[2,16,128], index: 7, kind: input, shape index: {}]   ;;  %s3087_s8 = inlined_call_operand.hbm [shape: f32[2,16,128], index: 8, kind: input, shape index: {}]   ;;  %s3088_s9 = inlined_call_operand.hbm [shape: bf16[2,16,256], index: 9, kind: output, shape index: {0}]   ;;  %s3089_s10 = inlined_call_operand.hbm [shape: bf16[2,16,256], index: 10, kind: output, shape index: {1}]   ;;  %s3090_s11 = inlined_call_operand.hbm [shape: bf16[2,16,256], index: 11, kind: output, shape index: {2}]  }
   0x1   :  { %3105 = sst [smem:[#allocation29_spill]] %s3079_s0 }
   0x2   :  { %3106 = sst [smem:[#allocation30_spill]] %s3080_s1 }
   0x3   :  { %3107 = sst [smem:[#allocation31_spill]] %s3090_s11 }
   0x4   :  { %17 = vsyncpa [#allocation3], 0 }
   0x5   :  { %19 = vsyncpa [#allocation3 + $0x1], 0 }
   0x6   :  { %20 = vsyncpa [#allocation6], 0 }
   0x7   :  { %21 = vsyncpa [#allocation9], 0 }
   0x8   :  { %22 = vsyncpa [#allocation4], 0 }
   0x9   :  { %24 = vsyncpa [#allocation4 + $0x1], 0 }
   0xa   :  { %25 = vsyncpa [#allocation14], 0 }
   0xb   :  { %27 = vsyncpa [#allocation14 + $0x1], 0  ;;  %s2604_s17 = smov 0   ;;  %s2606_s18 = smov 0  }
   0xc   :  { %s2608_s19 = smov 0   ;;  %s2610_s20 = smov 0  }
   0xd   :  { %s2612_s21 = smov 0   ;;  %s2614_s22 = smov 0  }
   0xe LB: > { %3108 = sst [smem:[#allocation22_spill]] %s2508_s17  ;;  %s45_s23 = sadd.s32 1, %s2524_s21  ;;  %s2528_s22 = sphi %s2614_s22, %s33_s22   ;;  %s2524_s21 = sphi %s2612_s21, %s3137_s21   ;;  %s2520_s20 = sphi %s2610_s20, %s3136_s20   ;;  %s2516_s19 = sphi %s2608_s19, %s3135_s19   ;;  %s2512_s18 = sphi %s2606_s18, %s3139_s18   ;;  %s2508_s17 = sphi %s2604_s17, %s3138_s17  }
   0xf   : > { %3109 = sst [smem:[#allocation23_spill]] %s2516_s19  ;;  %s54_s24 = sadd.s32 1, %s2516_s19 }
  0x10   : > { %3110 = sst [smem:[#allocation24_spill]] %s2524_s21  ;;  %p47_p0 = scmp.ge.s32.totalorder %s45_s23, 2 }
  0x11   : > { %3111 = sst [smem:[#allocation25_spill]] %s2528_s22  ;;  %p61_p1 = scmp.ne.s32.totalorder %s2516_s19, %s2512_s18 }
  0x12   : > { %p62_p2 = scmp.eq.s32.totalorder %s2528_s22, 0  ;;  %s3141_s23 = smov (%p47_p0, %s45_s23), 0 }
  0x13   : > { %3112 = sst [smem:[#allocation26_spill]] %s3141_s23  ;;  %s49_s26 = ssub.s32 %s2524_s21, %s3141_s23 }
  0x14   : > { %p2644_p3 = por %p62_p2, %p61_p1  ;;  %p52_p5 = scmp.eq.s32.totalorder %s49_s26, 0 }
  0x15   : > { %p2010_p6 = scmp.lt.s32.totalorder %s2528_s22, 2  ;;  %s405_s27 = sand.u32 1, %s2528_s22  }
  0x16   : > { %s407_s28 = sand.u32 1, %s2516_s19   ;;  %s2660_s12 = sshll.u32 %s2524_s21, 8 }
  0x17   : > { %s2655_s29 = scalar_select %p52_p5, %s2516_s19, %s54_s24  }
  0x18   : > { %s2657_s30 = sshll.u32 %s407_s28, 4  ;;  %s3115_s0 = sld [smem:[#allocation29_spill]] }
  0x19   : > { %3114 = sst [smem:[#allocation27_spill]] %s2655_s29  ;;  %s409_s16 = scalar_lea.vmem [#allocation2], %s2657_s30 }
  0x1a   : > { %s419_s11 = sshll.u32 %s409_s16, 4  ;;  %p2669_p7 = pnand %p2010_p6, %p2644_p3  ;;  %s420_s11 = int_to_ptr.vmem [resolvable:$true] %s419_s11 }
  0x1b   : > { %s2673_s24 = scalar_lea.sflag [#allocation3], %s405_s27  ;;  %s2231_s28 = scalar_lea.vmem %s420_s11, 256 }
  0x1c   : > { %p2220_p8 = pneg %p2669_p7  ;;  %p2232_p9 = scmp.ne.s32.totalorder %s420_s11, %s2231_s28 }
  0x1d   : > { %s2530_s13 = smov [#allocation2]  }
  0x1e   : > { %s418_s15 = scalar_lea.hbm %s3115_s0, %s2660_s12  ;;  %p2234_p10 = pnand %p2232_p9, %p2220_p8 }
  0x1f   : > { %s2236_s14 = sshll.u32 %s2530_s13, 4  ;;  %s2237_s14 = int_to_ptr.vmem [resolvable:$false] %s2236_s14 }
  0x20   : > { %p2235_p11 = pneg %p2234_p10  ;;  %s2238_s25 = scalar_lea.vmem %s2237_s14, 512 }
  0x21   : > { %p2239_p12 = scmp.lt.s32.totalorder %s420_s11, %s2237_s14  ;;  %p2240_p13 = scmp.lt.s32.totalorder %s2238_s25, %s2231_s28 }
  0x23   : > { %p2241_p0 = por %p2240_p13, %p2239_p12 }
  0x25   : > { %p2242_p2 = pnand %p2241_p0, %p2235_p11 }
  0x27   : > { %2245 = shalt.err (!%p2242_p2)
}
  0x28   : > { %s3093_s16 = smov 128   ;;  %s3095_s27 = smov 8  }
  0x29   : > { %1990 = dma.hbm_to_vmem [thread:$0]  (!%p2669_p7), %s418_s15, 256, %s420_s11, %s2673_s24, %s3093_s16, %s3093_s16, %s3095_s27  }
  0x2a   : > { %s2687_s28 = sadd.s32 4294967295, %s2528_s22   ;;  %s3092_s13 = sadd.s32 4294967294, %s2528_s22  }
  0x2b   : > { %p67_p3 = scmp.ne.s32.totalorder %s2512_s18, %s2508_s17  ;;  %p68_p5 = scmp.eq.s32.totalorder %s2687_s28, 0 }
  0x2c   : > { %p275_p6 = scmp.eq.s32.totalorder %s2687_s28, 1  ;;  %p281_p9 = scmp.eq.s32.totalorder %s3092_s13, 1 }
  0x2d   : > { %p1794_p10 = scmp.ge.s32.totalorder %s2528_s22, 1  ;;  %p2699_p11 = por %p68_p5, %p67_p3 }
  0x2e   : > { %p2706_p12 = por %p275_p6, %p61_p1  ;;  %p2710_p13 = por %p281_p9, %p67_p3 }
  0x2f   : > { %p344_p0 = scmp.lt.s32.totalorder %s2528_s22, 3  ;;  %s2533_s13 = smov [#allocation5]  }
  0x30   : > { %s3118_s11 = scalar_select %p2706_p12, 1, 0 }
  0x31   : > { %s3119_s15 = scalar_select %p2710_p13, 1, 0 }
  0x32   : > { %p2715_p2 = pnand %p1794_p10, %p344_p0  ;;  %s356_s16 = sshll.u32 %s2533_s13, 4  ;;  %s2719_s16 = int_to_ptr.vmem [resolvable:$true] %s356_s16 }
  0x33   : > { %3120 = sst [smem:[#allocation28_spill]] %s3119_s15  ;;  %s441_s23 = scalar_lea.hbm %s3086_s7, %s2660_s12 }
  0x34   : > { %p1977_p4 = pneg %p2715_p2  ;;  %s433_s21 = scalar_lea.vmem [#allocation10], %s2657_s30 }
  0x35   : > { %s442_s29 = sshll.u32 %s433_s21, 4  ;;  %s2534_s13 = smov [#allocation10]   ;;  %s443_s29 = int_to_ptr.vmem [resolvable:$true] %s442_s29 }
  0x36   : > { %p2730_p1 = pnand %p1977_p4, %p68_p5  ;;  %s2259_s22 = scalar_lea.vmem %s443_s29, 256 }
  0x37   : > { %p2260_p3 = scmp.ne.s32.totalorder %s443_s29, %s2259_s22  ;;  %s2264_s15 = sshll.u32 %s2534_s13, 4  ;;  %s2265_s15 = int_to_ptr.vmem [resolvable:$false] %s2264_s15 }
  0x38   : > { %s2266_s17 = scalar_lea.vmem %s2265_s15, 512  ;;  %p2267_p10 = scmp.lt.s32.totalorder %s443_s29, %s2265_s15 }
  0x39   : > { %p2262_p6 = pnand %p2260_p3, %p2220_p8  ;;  %p2268_p0 = scmp.lt.s32.totalorder %s2266_s17, %s2259_s22 }
  0x3b   : > { %p2263_p9 = pneg %p2262_p6  ;;  %p2269_p13 = por %p2268_p0, %p2267_p10 }
  0x3d   : > { %p2270_p12 = pnand %p2269_p13, %p2263_p9 }
  0x3f   : > { %2273 = shalt.err (!%p2270_p12)
}
  0x40   : > { %s3123_s0 = smov 8   ;;  %s3124_s21 = smov 128  }
  0x41   : > { %1993 = dma.hbm_to_vmem [thread:$0]  (!%p2669_p7), %s441_s23, 256, %s443_s29, %s2673_s24, %s3124_s21, %s3124_s21, %s3123_s0  }
  0x42   : > { %s2535_s27 = smov [#allocation7]   ;;  %p2276_p4 = pneg %p2730_p1 }
  0x43   : > { %s369_s13 = sshll.u32 %s2535_s27, 4  ;;  %s2285_s17 = scalar_lea.vmem %s2719_s16, 4096  ;;  %s370_s13 = int_to_ptr.vmem [resolvable:$true] %s369_s13 }
  0x44   : > { %p2286_p3 = scmp.ne.s32.totalorder %s2719_s16, %s2285_s17  ;;  %p2293_p6 = scmp.lt.s32.totalorder %s2719_s16, %s2719_s16 }
  0x45   : > { %p2294_p9 = scmp.lt.s32.totalorder %s2285_s17, %s2285_s17 }
  0x46   : > { %p2288_p12 = pnand %p2286_p3, %p2276_p4 }
  0x47   : > { %p2295_p10 = por %p2294_p9, %p2293_p6 }
  0x48   : > { %p2289_p13 = pneg %p2288_p12 }
  0x4a   : > { %p2296_p0 = pnand %p2295_p10, %p2289_p13 }
  0x4c   : > { %2299 = shalt.err (!%p2296_p0)
}
  0x4d   : > { %s3125_s1 = sld [smem:[#allocation30_spill]]  ;;  %s2311_s29 = scalar_lea.vmem %s370_s13, 4096 }
  0x4e   : > { %p2312_p3 = scmp.ne.s32.totalorder %s370_s13, %s2311_s29  ;;  %p2319_p13 = scmp.lt.s32.totalorder %s370_s13, %s370_s13 }
  0x4f   : > { %p2320_p9 = scmp.lt.s32.totalorder %s2311_s29, %s2311_s29 }
  0x50   : > { %p2314_p12 = pnand %p2312_p3, %p2276_p4 }
  0x51   : > { %p2321_p10 = por %p2320_p9, %p2319_p13 }
  0x52   : > { %p2315_p6 = pneg %p2314_p12 }
  0x53   : > { %1980 = dma.hbm_to_vmem [thread:$0]  (!%p2730_p1), %s3125_s1, 4096, %s2719_s16, [#allocation6], %s3124_s21, %s3124_s21, %s3123_s0  }
  0x54   : > { %p2322_p0 = pnand %p2321_p10, %p2315_p6 }
  0x56   : > { %2325 = shalt.err (!%p2322_p0)
}
  0x57   : > { %1983 = dma.hbm_to_vmem [thread:$0]  (!%p2730_p1), %s3081_s2, 4096, %s370_s13, [#allocation6], %s3124_s21, %s3124_s21, %s3123_s0  }
  0x58   : > { %s2536_s16 = smov [#allocation8]   ;;  %s464_s29 = scalar_lea.hbm %s3087_s8, %s2660_s12 }
  0x59   : > { %s382_s17 = sshll.u32 %s2536_s16, 4  ;;  %s383_s17 = int_to_ptr.vmem [resolvable:$true] %s382_s17 }
  0x5a   : > { %s2337_s1 = scalar_lea.vmem %s383_s17, 4096  ;;  %p2345_p13 = scmp.lt.s32.totalorder %s383_s17, %s383_s17 }
  0x5b   : > { %p2338_p3 = scmp.ne.s32.totalorder %s383_s17, %s2337_s1  ;;  %p2346_p9 = scmp.lt.s32.totalorder %s2337_s1, %s2337_s1 }
  0x5d   : > { %p2340_p12 = pnand %p2338_p3, %p2276_p4  ;;  %p2347_p10 = por %p2346_p9, %p2345_p13 }
  0x5f   : > { %p2341_p6 = pneg %p2340_p12 }
  0x61   : > { %p2348_p0 = pnand %p2347_p10, %p2341_p6 }
  0x63   : > { %2351 = shalt.err (!%p2348_p0)
}
  0x64   : > { %1986 = dma.hbm_to_vmem [thread:$0]  (!%p2730_p1), %s3082_s3, 4096, %s383_s17, [#allocation9], %s3124_s21, %s3124_s21, %s3123_s0  }
  0x65   : > { %s456_s27 = scalar_lea.vmem [#allocation11], %s2657_s30  ;;  %s2537_s1 = smov [#allocation11]  }
  0x66   : > { %s465_s16 = sshll.u32 %s456_s27, 4  ;;  %s2370_s19 = sshll.u32 %s2537_s1, 4  ;;  %s466_s16 = int_to_ptr.vmem [resolvable:$true] %s465_s16  ;;  %s2371_s19 = int_to_ptr.vmem [resolvable:$false] %s2370_s19 }
  0x67   : > { %s2365_s22 = scalar_lea.vmem %s466_s16, 256  ;;  %s2372_s23 = scalar_lea.vmem %s2371_s19, 512 }
  0x68   : > { %p2366_p4 = scmp.ne.s32.totalorder %s466_s16, %s2365_s22  ;;  %p2373_p6 = scmp.lt.s32.totalorder %s466_s16, %s2371_s19 }
  0x69   : > { %p2374_p13 = scmp.lt.s32.totalorder %s2372_s23, %s2365_s22 }
  0x6a   : > { %p2368_p3 = pnand %p2366_p4, %p2220_p8 }
  0x6b   : > { %p2375_p9 = por %p2374_p13, %p2373_p6 }
  0x6c   : > { %p2369_p12 = pneg %p2368_p3 }
  0x6e   : > { %p2376_p10 = pnand %p2375_p9, %p2369_p12 }
  0x70   : > { %2379 = shalt.err (!%p2376_p10)
}
  0x71   : > { %1996 = dma.hbm_to_vmem [thread:$0]  (!%p2669_p7), %s464_s29, 256, %s466_s16, %s2673_s24, %s3124_s21, %s3124_s21, %s3123_s0  }
  0x72   : > { %477 = sbr.rel (%p2715_p2) target bundleno = 593 (0x251), region = 56  ;;  %s479_s13 = sand.u32 (!%p2715_p2), 1, %s2687_s28  }
  0x73   : > { %s481_s26 = sand.u32 (!%p2715_p2), 1, %s2512_s18   ;;  %s480_s27 = scalar_lea.sflag (!%p2715_p2), [#allocation3], %s479_s13 }
  0x74   : > { %s2808_s15 = sshll.u32 (!%p2715_p2), %s481_s26, 4 }
  0x75   : > { %s483_s22 = scalar_lea.vmem (!%p2715_p2), [#allocation2], %s2808_s15 }
  0x77   : > { %2483 = dma.done.wait (%p2699_p11), %s480_s27, 256  }
  0x78   : > { %2485 = vsyncadd (%p2699_p11), %s480_s27, 4294967040 }
  0x79   : > { %2487 = dma.done.wait (%p68_p5), [#allocation6], 8192  }
  0x7a   : > { %2489 = vsyncadd (%p68_p5), [#allocation6], 4294959104 }
  0x7b   : > { %2491 = dma.done.wait (%p68_p5), [#allocation9], 4096  }
  0x7c   : > { %2493 = vsyncadd (%p68_p5), [#allocation9], 4294963200  ;;  %s504_s12 = scalar_lea.vmem [#allocation10], %s2808_s15 }
  0x7d   : > { %2495 = dma.done.wait (%p2699_p11), %s480_s27, 512  }
  0x7e   : > { %2497 = vsyncadd (%p2699_p11), %s480_s27, 4294966784  ;;  %v2071_v0 = vld [vmem:[#allocation5 + $0x74] ss:$8 sps:$4 sm:$0xff]   ;;  %v2075_v2 = vld [vmem:[#allocation5 + $0x70] ss:$8 sps:$4 sm:$0xff]   ;;  %s2538_s21 = smov 64  }
  0x7f   : > { %v2073_v1 = vld [vmem:[#allocation7 + $0x74] ss:$8 sps:$4 sm:$0xff]   ;;  %794 = vmatprep.subr.bf16.mxu0 %v2071_v0  ;;  %v2076_v3 = vld [vmem:[#allocation7 + $0x70] ss:$8 sps:$4 sm:$0xff]   ;;  %v2077_v4 = vld [vmem:[#allocation5 + $0x64] ss:$8 sps:$4 sm:$0xff]  }
  0x80   : > { %1041 = vmatprep.subr.bf16.mxu1 %v2073_v1  ;;  %795 = vmatpush1.bf16.msra.mxu0 %v2075_v2  ;;  %v2079_v5 = vld [vmem:[#allocation7 + $0x64] ss:$8 sps:$4 sm:$0xff]   ;;  %v2081_v6 = vld [vmem:[#allocation5 + $0x60] ss:$8 sps:$4 sm:$0xff]   ;;  %v2083_v8 = vld [vmem:[#allocation5 + $0x54] ss:$8 sps:$4 sm:$0xff]  }
  0x81   : > { %1042 = vmatpush1.bf16.msra.mxu1 %v2076_v3  ;;  %796 = vmatprep.subr.bf16.mxu0 %v2077_v4  ;;  %v2082_v7 = vld [vmem:[#allocation7 + $0x60] ss:$8 sps:$4 sm:$0xff]   ;;  %v2085_v9 = vld [vmem:[#allocation7 + $0x54] ss:$8 sps:$4 sm:$0xff]   ;;  %v2087_v10 = vld [vmem:[#allocation5 + $0x50] ss:$8 sps:$4 sm:$0xff]  }
  0x82   : > { %1043 = vmatprep.subr.bf16.mxu1 %v2079_v5  ;;  %v2088_v11 = vld [vmem:[#allocation7 + $0x50] ss:$8 sps:$4 sm:$0xff]   ;;  %v2089_v12 = vld [vmem:[#allocation5 + $0x44] ss:$8 sps:$4 sm:$0xff]   ;;  %v2093_v14 = vld [vmem:[#allocation5 + $0x40] ss:$8 sps:$4 sm:$0xff]  }
  0x83   : > { %v2091_v13 = vld [vmem:[#allocation7 + $0x44] ss:$8 sps:$4 sm:$0xff]   ;;  %v2094_v15 = vld [vmem:[#allocation7 + $0x40] ss:$8 sps:$4 sm:$0xff]   ;;  %v2095_v16 = vld [vmem:[#allocation5 + $0x34] ss:$8 sps:$4 sm:$0xff]  }
  0x84   : > { %797 = vmatpush1.bf16.msra.mxu0 %v2081_v6  ;;  %v2097_v17 = vld [vmem:[#allocation7 + $0x34] ss:$8 sps:$4 sm:$0xff]   ;;  %v2099_v18 = vld [vmem:[#allocation5 + $0x30] ss:$8 sps:$4 sm:$0xff]   ;;  %v2101_v20 = vld [vmem:[#allocation5 + $0x24] ss:$8 sps:$4 sm:$0xff]  }
  0x85   : > { %1044 = vmatpush1.bf16.msra.mxu1 %v2082_v7  ;;  %798 = vmatprep.subr.bf16.mxu0 %v2083_v8  ;;  %v2100_v19 = vld [vmem:[#allocation7 + $0x30] ss:$8 sps:$4 sm:$0xff]   ;;  %v2103_v21 = vld [vmem:[#allocation7 + $0x24] ss:$8 sps:$4 sm:$0xff]   ;;  %v2105_v22 = vld [vmem:[#allocation5 + $0x20] ss:$8 sps:$4 sm:$0xff]  }
  0x86   : > { %1045 = vmatprep.subr.bf16.mxu1 %v2085_v9  ;;  %v2106_v23 = vld [vmem:[#allocation7 + $0x20] ss:$8 sps:$4 sm:$0xff]   ;;  %v2107_v24 = vld [vmem:[#allocation5 + $0x14] ss:$8 sps:$4 sm:$0xff]   ;;  %v2111_v26 = vld [vmem:[#allocation5 + $0x10] ss:$8 sps:$4 sm:$0xff]  }
  0x87   : > { %v2109_v25 = vld [vmem:[#allocation7 + $0x14] ss:$8 sps:$4 sm:$0xff]   ;;  %v2112_v27 = vld [vmem:[#allocation7 + $0x10] ss:$8 sps:$4 sm:$0xff]   ;;  %v2113_v28 = vld [vmem:[#allocation5 + $0x4] ss:$8 sps:$4 sm:$0xff]  }
  0x88   : > { %799 = vmatpush1.bf16.msra.mxu0 %v2087_v10  ;;  %v2115_v29 = vld [vmem:[#allocation7 + $0x4] ss:$8 sps:$4 sm:$0xff]   ;;  %v2117_v30 = vld [vmem:[#allocation5] ss:$8 sps:$4 sm:$0xff]   ;;  %v2119_v32 = vld [vmem:[#allocation5 + $0xf4] ss:$8 sps:$4 sm:$0xff]  }
  0x89   : > { %1046 = vmatpush1.bf16.msra.mxu1 %v2088_v11  ;;  %800 = vmatprep.subr.bf16.mxu0 %v2089_v12  ;;  %v2118_v31 = vld [vmem:[#allocation7] ss:$8 sps:$4 sm:$0xff]   ;;  %v2121_v33 = vld [vmem:[#allocation7 + $0xf4] ss:$8 sps:$4 sm:$0xff]   ;;  %v2123_v34 = vld [vmem:[#allocation5 + $0xf0] ss:$8 sps:$4 sm:$0xff]  }
  0x8a   : > { %1047 = vmatprep.subr.bf16.mxu1 %v2091_v13  ;;  %v2124_v35 = vld [vmem:[#allocation7 + $0xf0] ss:$8 sps:$4 sm:$0xff]   ;;  %v2125_v36 = vld [vmem:[#allocation5 + $0xe4] ss:$8 sps:$4 sm:$0xff]   ;;  %v2129_v38 = vld [vmem:[#allocation5 + $0xe0] ss:$8 sps:$4 sm:$0xff]  }
  0x8b   : > { %v2127_v37 = vld [vmem:[#allocation7 + $0xe4] ss:$8 sps:$4 sm:$0xff]   ;;  %v2130_v39 = vld [vmem:[#allocation7 + $0xe0] ss:$8 sps:$4 sm:$0xff]   ;;  %v2131_v40 = vld [vmem:[#allocation5 + $0xd4] ss:$8 sps:$4 sm:$0xff]  }
  0x8c   : > { %801 = vmatpush1.bf16.msra.mxu0 %v2093_v14  ;;  %v2133_v41 = vld [vmem:[#allocation7 + $0xd4] ss:$8 sps:$4 sm:$0xff]   ;;  %v2135_v42 = vld [vmem:[#allocation5 + $0xd0] ss:$8 sps:$4 sm:$0xff]   ;;  %v2137_v44 = vld [vmem:[#allocation5 + $0xc4] ss:$8 sps:$4 sm:$0xff]  }
  0x8d   : > { %1048 = vmatpush1.bf16.msra.mxu1 %v2094_v15  ;;  %802 = vmatprep.subr.bf16.mxu0 %v2095_v16  ;;  %v2136_v43 = vld [vmem:[#allocation7 + $0xd0] ss:$8 sps:$4 sm:$0xff]   ;;  %v2139_v45 = vld [vmem:[#allocation7 + $0xc4] ss:$8 sps:$4 sm:$0xff]   ;;  %v2141_v46 = vld [vmem:[#allocation5 + $0xc0] ss:$8 sps:$4 sm:$0xff]  }
  0x8e   : > { %1049 = vmatprep.subr.bf16.mxu1 %v2097_v17  ;;  %v2142_v47 = vld [vmem:[#allocation7 + $0xc0] ss:$8 sps:$4 sm:$0xff]   ;;  %v2167_v48 = vld [vmem:[%s483_s22 + $0x4] ss:$8 sps:$4 sm:$0xff]   ;;  %v2147_v51 = vld [vmem:[#allocation5 + $0xb0] ss:$8 sps:$4 sm:$0xff]  }
  0x8f   : > { %v2143_v49 = vld [vmem:[#allocation5 + $0xb4] ss:$8 sps:$4 sm:$0xff]   ;;  %826 = vmatprep.mubr.bf16.mxu0 %v2167_v48  ;;  %1073 = vmatprep.mubr.bf16.mxu1 %v2167_v48  ;;  %v2148_v52 = vld [vmem:[#allocation7 + $0xb0] ss:$8 sps:$4 sm:$0xff]   ;;  %v2149_v53 = vld [vmem:[#allocation5 + $0xa4] ss:$8 sps:$4 sm:$0xff]  }
  0x90   : > { %803 = vmatpush1.bf16.msra.mxu0 %v2099_v18  ;;  %v2145_v50 = vld [vmem:[#allocation7 + $0xb4] ss:$8 sps:$4 sm:$0xff]   ;;  %v2151_v54 = vld [vmem:[#allocation7 + $0xa4] ss:$8 sps:$4 sm:$0xff]   ;;  %v2153_v55 = vld [vmem:[#allocation5 + $0xa0] ss:$8 sps:$4 sm:$0xff]  }
  0x91   : > { %1050 = vmatpush1.bf16.msra.mxu1 %v2100_v19  ;;  %804 = vmatprep.subr.bf16.mxu0 %v2101_v20  ;;  %v2154_v56 = vld [vmem:[#allocation7 + $0xa0] ss:$8 sps:$4 sm:$0xff]   ;;  %v2155_v57 = vld [vmem:[#allocation5 + $0x94] ss:$8 sps:$4 sm:$0xff]   ;;  %v2159_v59 = vld [vmem:[#allocation5 + $0x90] ss:$8 sps:$4 sm:$0xff]  }
  0x92   : > { %1051 = vmatprep.subr.bf16.mxu1 %v2103_v21  ;;  %v2157_v58 = vld [vmem:[#allocation7 + $0x94] ss:$8 sps:$4 sm:$0xff]   ;;  %v2160_v60 = vld [vmem:[#allocation7 + $0x90] ss:$8 sps:$4 sm:$0xff]   ;;  %v2161_v61 = vld [vmem:[#allocation5 + $0x84] ss:$8 sps:$4 sm:$0xff]  }
  0x93   : > { %v2163_v62 = vld [vmem:[#allocation7 + $0x84] ss:$8 sps:$4 sm:$0xff]   ;;  %v2165_v63 = vld [vmem:[#allocation5 + $0x80] ss:$8 sps:$4 sm:$0xff]   ;;  %v2172_v1 = vld [vmem:[#allocation8 + $0x74] ss:$8 sps:$4 sm:$0xff]  }
  0x94   : > { %805 = vmatpush1.bf16.msra.mxu0 %v2105_v22  ;;  %v2166_v0 = vld [vmem:[#allocation7 + $0x80] ss:$8 sps:$4 sm:$0xff]   ;;  %v2170_v3 = vld [vmem:[#allocation8 + $0x70] ss:$8 sps:$4 sm:$0xff]   ;;  %v2175_v4 = vld [vmem:[#allocation8 + $0x64] ss:$8 sps:$4 sm:$0xff]  }
  0x95   : > { %1052 = vmatpush1.bf16.msra.mxu1 %v2106_v23  ;;  %806 = vmatprep.subr.bf16.mxu0 %v2107_v24  ;;  %v2834_v2 = vld [vmem:[%s483_s22] ss:$8 sps:$4 sm:$0xff]   ;;  %v2178_v6 = vld [vmem:[#allocation8 + $0x54] ss:$8 sps:$4 sm:$0xff]   ;;  %v2181_v8 = vld [vmem:[#allocation8 + $0x44] ss:$8 sps:$4 sm:$0xff]  }
  0x96   : > { %1053 = vmatprep.subr.bf16.mxu1 %v2109_v25  ;;  %v2173_v5 = vld [vmem:[#allocation8 + $0x60] ss:$8 sps:$4 sm:$0xff]   ;;  %v2176_v7 = vld [vmem:[#allocation8 + $0x50] ss:$8 sps:$4 sm:$0xff]   ;;  %v2184_v10 = vld [vmem:[#allocation8 + $0x34] ss:$8 sps:$4 sm:$0xff]  }
  0x97   : > { %v2179_v9 = vld [vmem:[#allocation8 + $0x40] ss:$8 sps:$4 sm:$0xff]   ;;  %v2182_v11 = vld [vmem:[#allocation8 + $0x30] ss:$8 sps:$4 sm:$0xff]   ;;  %v2187_v12 = vld [vmem:[#allocation8 + $0x24] ss:$8 sps:$4 sm:$0xff]  }
  0x98   : > { %807 = vmatpush1.bf16.msra.mxu0 %v2111_v26  ;;  %v2185_v13 = vld [vmem:[#allocation8 + $0x20] ss:$8 sps:$4 sm:$0xff]   ;;  %v2190_v14 = vld [vmem:[#allocation8 + $0x14] ss:$8 sps:$4 sm:$0xff]   ;;  %v2188_v15 = vld [vmem:[#allocation8 + $0x10] ss:$8 sps:$4 sm:$0xff]  }
  0x99   : > { %1054 = vmatpush1.bf16.msra.mxu1 %v2112_v27  ;;  %808 = vmatprep.subr.bf16.mxu0 %v2113_v28  ;;  %v2193_v16 = vld [vmem:[#allocation8 + $0x4] ss:$8 sps:$4 sm:$0xff]   ;;  %v2191_v17 = vld [vmem:[#allocation8] ss:$8 sps:$4 sm:$0xff]   ;;  %v2196_v18 = vld [vmem:[#allocation8 + $0xf4] ss:$8 sps:$4 sm:$0xff]  }
  0x9a   : > { %1055 = vmatprep.subr.bf16.mxu1 %v2115_v29  ;;  %v2194_v19 = vld [vmem:[#allocation8 + $0xf0] ss:$8 sps:$4 sm:$0xff]   ;;  %v2199_v20 = vld [vmem:[#allocation8 + $0xe4] ss:$8 sps:$4 sm:$0xff]   ;;  %v2197_v21 = vld [vmem:[#allocation8 + $0xe0] ss:$8 sps:$4 sm:$0xff]  }
  0x9b   : > { %v2202_v22 = vld [vmem:[#allocation8 + $0xd4] ss:$8 sps:$4 sm:$0xff]   ;;  %v2200_v23 = vld [vmem:[#allocation8 + $0xd0] ss:$8 sps:$4 sm:$0xff]   ;;  %v2205_v24 = vld [vmem:[#allocation8 + $0xc4] ss:$8 sps:$4 sm:$0xff]  }
  0x9c   : > { %809 = vmatpush1.bf16.msra.mxu0 %v2117_v30  ;;  %v2203_v25 = vld [vmem:[#allocation8 + $0xc0] ss:$8 sps:$4 sm:$0xff]   ;;  %v2208_v26 = vld [vmem:[#allocation8 + $0xb4] ss:$8 sps:$4 sm:$0xff]   ;;  %v2206_v27 = vld [vmem:[#allocation8 + $0xb0] ss:$8 sps:$4 sm:$0xff]  }
  0x9d   : > { %1056 = vmatpush1.bf16.msra.mxu1 %v2118_v31  ;;  %810 = vmatprep.subr.bf16.mxu0 %v2119_v32  ;;  %v2211_v28 = vld [vmem:[#allocation8 + $0xa4] ss:$8 sps:$4 sm:$0xff]   ;;  %v2209_v29 = vld [vmem:[#allocation8 + $0xa0] ss:$8 sps:$4 sm:$0xff]   ;;  %v2214_v30 = vld [vmem:[#allocation8 + $0x94] ss:$8 sps:$4 sm:$0xff]  }
  0x9e   : > { %1057 = vmatprep.subr.bf16.mxu1 %v2121_v33  ;;  %v2212_v31 = vld [vmem:[#allocation8 + $0x90] ss:$8 sps:$4 sm:$0xff]   ;;  %v2217_v32 = vld [vmem:[#allocation8 + $0x84] ss:$8 sps:$4 sm:$0xff]   ;;  %v2215_v33 = vld [vmem:[#allocation8 + $0x80] ss:$8 sps:$4 sm:$0xff]  }
  0x9f   : > { %s2897_s1 = scalar_lea.vmem [#allocation15], %s2808_s15  ;;  %vm1353_vm0 = vcmask 523264   ;;  %s513_s19 = scalar_lea.vmem [#allocation11], %s2808_s15 }
  0xa0   : > { %811 = vmatpush2.bf16.msra.mxu0 %v2123_v34  ;;  %v614_v34 = vlaneseq  ;;  %s2912_s23 = scalar_lea.vmem [#allocation12], %s2808_s15  ;;  %s2924_s30 = scalar_lea.vmem [#allocation13], %s2808_s15 }
  0xa1   : > { %1058 = vmatpush2.bf16.msra.mxu1 %v2124_v35  ;;  %812 = vmatprep.subr.bf16.mxu0 %v2125_v36  ;;  %s1525_s17 = sshll.u32 %s2912_s23, 4  ;;  %s2936_s15 = sshll.u32 %s2520_s20, 8  ;;  %s2939_s17 = int_to_ptr.vmem [resolvable:$true] %s1525_s17 }
  0xa2   : > { %1059 = vmatprep.subr.bf16.mxu1 %v2127_v37  ;;  %v615_v35 = vshrl.u32 %v614_v34, 7  ;;  %v612_v37 = vld [vmem:[%s3083_s4] sm:$0x3]  ;;  %s1544_s27 = sshll.u32 %s2924_s30, 4  ;;  %s1563_s24 = sshll.u32 %s2897_s1, 4  ;;  %s2952_s27 = int_to_ptr.vmem [resolvable:$true] %s1544_s27  ;;  %s2992_s24 = int_to_ptr.vmem [resolvable:$true] %s1563_s24 }
  0xa3   : > { %s2960_s0 = scalar_lea.hbm %s3089_s10, %s2936_s15  ;;  %s2380_s29 = scalar_lea.vmem %s2939_s17, 256 }
  0xa4   : > { %813 = vmatpush2.bf16.msra.mxu0 %v2129_v38  ;;  %v616_v36 = vsub.s32 0, %v615_v35  ;;  %v869_v38 = vld [vmem:[%s3084_s5] sm:$0x3]  ;;  %p2381_p7 = scmp.ne.s32.totalorder %s2939_s17, %s2380_s29  ;;  %p3126_p8 = scmp.ne.s32.totalorder %s3118_s11, 0 }
  0xa5   : > { %1060 = vmatpush2.bf16.msra.mxu1 %v2130_v39  ;;  %814 = vmatprep.subr.bf16.mxu0 %v2131_v40  ;;  %s2539_s16 = smov [#allocation12]  }
  0xa6   : > { %1061 = vmatprep.subr.bf16.mxu1 %v2133_v41  ;;  %v617_v39 = vrot.slane %v612_v37, %v616_v36  ;;  %v874_v40 = vrot.slane %v869_v38, %v616_v36  ;;  %p2382_p5 = pnand %p2381_p7, %p3126_p8 }
  0xa8   : > { %815 = vmatpush2.bf16.msra.mxu0 %v2135_v42  ;;  %p2383_p11 = pneg %p2382_p5 }
  0xa9   : > { %1062 = vmatpush2.bf16.msra.mxu1 %v2136_v43  ;;  %816 = vmatprep.subr.bf16.mxu0 %v2137_v44 }
  0xaa   : > { %1063 = vmatprep.subr.bf16.mxu1 %v2139_v45  ;;  %v620_v45 = vsub.s32 1, %v615_v35 }
  0xac   : > { %817 = vmatpush2.bf16.msra.mxu0 %v2141_v46 }
  0xad   : > { %1064 = vmatpush2.bf16.msra.mxu1 %v2142_v47  ;;  %818 = vmatprep.subr.bf16.mxu0 %v2143_v49  ;;  %v621_v49 = vrot.slane %v612_v37, %v620_v45 }
  0xae   : > { %1065 = vmatprep.subr.bf16.mxu1 %v2145_v50 }
  0xb0   : > { %819 = vmatpush2.bf16.msra.mxu0 %v2147_v51 }
  0xb1   : > { %1066 = vmatpush2.bf16.msra.mxu1 %v2148_v52  ;;  %820 = vmatprep.subr.bf16.mxu0 %v2149_v53 }
  0xb2   : > { %1067 = vmatprep.subr.bf16.mxu1 %v2151_v54 }
  0xb4   : > { %821 = vmatpush2.bf16.msra.mxu0 %v2153_v55 }
  0xb5   : > { %1068 = vmatpush2.bf16.msra.mxu1 %v2154_v56  ;;  %822 = vmatprep.subr.bf16.mxu0 %v2155_v57  ;;  %v878_v56 = vrot.slane %v869_v38, %v620_v45  ;;  %v1334_v38 = vld [vmem:[%s513_s19 + $0x8] sm:$0xff] }
  0xb6   : > { %1069 = vmatprep.subr.bf16.mxu1 %v2157_v58 }
  0xb8   : > { %823 = vmatpush2.bf16.msra.mxu0 %v2159_v59 }
  0xb9   : > { %1070 = vmatpush2.bf16.msra.mxu1 %v2160_v60  ;;  %824 = vmatprep.subr.bf16.mxu0 %v2161_v61 }
  0xba   : > { %1071 = vmatprep.subr.bf16.mxu1 %v2163_v62 }
  0xbc   : > { %825 = vmatpush2.bf16.msra.mxu0 %v2165_v63 }
  0xbd   : > { %1072 = vmatpush2.bf16.msra.mxu1 %v2166_v0  ;;  %1288 = vmatprep.subr.bf16.mxu0 %v2172_v1 }
  0xbf   : > { %827 = vmatmul.mubr.bf16.vlgmr.msra.gmra.mxu0 %v2834_v2 }
  0xc0   : > { %1074 = vmatmul.mubr.bf16.vlgmr.msra.gmra.mxu1 %v2834_v2  ;;  %1289 = vmatpush1.bf16.msra.mxu0 %v2170_v3 }
  0xc1   : > { %1320 = vmatprep.mubr.bf16.mxu0 %v2167_v48  ;;  %1290 = vmatprep.subr.bf16.mxu0 %v2175_v4  ;;  %v1116_v4 = vld [vmem:[%s3085_s6] sm:$0x3] }
  0xc4   : > { %1291 = vmatpush1.bf16.msra.mxu0 %v2173_v5  ;;  %v1121_v5 = vrot.slane %v1116_v4, %v616_v36  ;;  %v1332_v36 = vld [vmem:[%s504_s12 + $0x8] sm:$0xff] }
  0xc5   : > { %1292 = vmatprep.subr.bf16.mxu0 %v2178_v6  ;;  %v1125_v6 = vrot.slane %v1116_v4, %v620_v45 }
  0xc8   : > { %1293 = vmatpush1.bf16.msra.mxu0 %v2176_v7 }
  0xc9   : > { %1294 = vmatprep.subr.bf16.mxu0 %v2181_v8 }
  0xcc   : > { %1295 = vmatpush1.bf16.msra.mxu0 %v2179_v9 }
  0xcd   : > { %1296 = vmatprep.subr.bf16.mxu0 %v2184_v10 }
  0xd0   : > { %1297 = vmatpush1.bf16.msra.mxu0 %v2182_v11 }
  0xd1   : > { %1298 = vmatprep.subr.bf16.mxu0 %v2187_v12 }
  0xd4   : > { %1299 = vmatpush1.bf16.msra.mxu0 %v2185_v13 }
  0xd5   : > { %1300 = vmatprep.subr.bf16.mxu0 %v2190_v14 }
  0xd8   : > { %1301 = vmatpush1.bf16.msra.mxu0 %v2188_v15 }
  0xd9   : > { %1302 = vmatprep.subr.bf16.mxu0 %v2193_v16 }
  0xdc   : > { %1303 = vmatpush1.bf16.msra.mxu0 %v2191_v17 }
  0xdd   : > { %1304 = vmatprep.subr.bf16.mxu0 %v2196_v18 }
  0xe0   : > { %1305 = vmatpush2.bf16.msra.mxu0 %v2194_v19  ;;  %v1331_v19 = vld [vmem:[%s504_s12] sm:$0xff]  ;;  %s2950_s12 = scalar_lea.hbm %s3088_s9, %s2936_s15 }
  0xe1   : > { %1306 = vmatprep.subr.bf16.mxu0 %v2199_v20  ;;  %v2904_v20 = vld [vmem:[%s513_s19] sm:$0xff]  ;;  %s2384_s19 = sshll.u32 %s2539_s16, 4  ;;  %s2385_s19 = int_to_ptr.vmem [resolvable:$false] %s2384_s19 }
  0xe2   : > { %s2386_s20 = scalar_lea.vmem %s2385_s19, 512  ;;  %p2387_p2 = scmp.lt.s32.totalorder %s2939_s17, %s2385_s19 }
  0xe3   : > { %p2388_p1 = scmp.lt.s32.totalorder %s2386_s20, %s2380_s29 }
  0xe4   : > { %1307 = vmatpush2.bf16.msra.mxu0 %v2197_v21 }
  0xe5   : > { %1308 = vmatprep.subr.bf16.mxu0 %v2202_v22  ;;  %p2389_p0 = por %p2388_p1, %p2387_p2 }
  0xe7   : > { %p2390_p4 = pnand %p2389_p0, %p2383_p11 }
  0xe8   : > { %1309 = vmatpush2.bf16.msra.mxu0 %v2200_v23 }
  0xe9   : > { %1310 = vmatprep.subr.bf16.mxu0 %v2205_v24 }
  0xec   : > { %1311 = vmatpush2.bf16.msra.mxu0 %v2203_v25 }
  0xed   : > { %1312 = vmatprep.subr.bf16.mxu0 %v2208_v26 }
  0xf0   : > { %1313 = vmatpush2.bf16.msra.mxu0 %v2206_v27 }
  0xf1   : > { %1314 = vmatprep.subr.bf16.mxu0 %v2211_v28 }
  0xf4   : > { %1315 = vmatpush2.bf16.msra.mxu0 %v2209_v29 }
  0xf5   : > { %1316 = vmatprep.subr.bf16.mxu0 %v2214_v30 }
  0xf8   : > { %1317 = vmatpush2.bf16.msra.mxu0 %v2212_v31 }
  0xf9   : > { %1318 = vmatprep.subr.bf16.mxu0 %v2217_v32 }
  0xfc   : > { %1319 = vmatpush2.bf16.msra.mxu0 %v2215_v33 }
  0xff   : > { %1321 = vmatmul.mubr.bf16.vlgmr.msra.gmra.mxu0 %v2834_v2 }
 0x17f   : > { %v828_v41 = vpop.f32.mrf.mxu0 }
 0x180   : > { %v1075_v42 = vpop.f32.mrf.mxu1  ;;  %v2845_v43 = vadd.f32 %v828_v41, %v617_v39 }
 0x181   : > { %v2847_v44 = vadd.f32 %v1075_v42, %v874_v40  ;;  %v830_v46 = vpop.f32.mrf.mxu0 }
 0x182   : > { %v1077_v47 = vpop.f32.mrf.mxu1  ;;  %1347 = vrot.lane.b32.xlu1 %v2845_v43, %s2538_s21  ;;  %v1335_v51 = vsub.f32 0.0, %v2845_v43  ;;  %v2859_v53 = vadd.f32 %v830_v46, %v621_v49  ;;  %v1356_v24 = vmul.f32 %v1331_v19, %v2845_v43 }
 0x183   : > { %1386 = vrot.lane.b32.xlu0 %v2847_v44, %s2538_s21  ;;  %v832_v48 = vpop.f32.mrf.mxu0  ;;  %v1374_v57 = vsub.f32 0.0, %v2847_v44  ;;  %v2873_v59 = vadd.f32 %v1077_v47, %v878_v56  ;;  %v1394_v34 = vmul.f32 %v1331_v19, %v2847_v44 }
 0x184   : > { %v2853_v50 = vadd.f32 %v832_v48, %v617_v39  ;;  %v1079_v52 = vpop.f32.mrf.mxu1  ;;  %v1410_v60 = vsub.f32 0.0, %v2859_v53  ;;  %v1430_v42 = vmul.f32 %v1331_v19, %v2859_v53 }
 0x185   : > { %v2861_v54 = vadd.f32 %v1079_v52, %v874_v40  ;;  %v834_v55 = vpop.f32.mrf.mxu0  ;;  %v1448_v63 = vsub.f32 0.0, %v2873_v59 }
 0x186   : > { %1349 = vrot.lane.b32.xlu1 %v2853_v50, %s2538_s21  ;;  %v2868_v58 = vadd.f32 %v834_v55, %v621_v49  ;;  %v1081_v62 = vpop.f32.mrf.mxu1  ;;  %v1336_v2 = vsub.f32 0.0, %v2853_v50 }
 0x187   : > { %1339 = vrot.lane.b32.xlu0 %v1335_v51, %s2538_s21  ;;  %v1375_v61 = vsub.f32 0.0, %v2861_v54  ;;  %v2880_v0 = vadd.f32 %v1081_v62, %v878_v56  ;;  %v1395_v46 = vmul.f32 %v1332_v36, %v2861_v54 }
 0x188   : > { %v1411_v1 = vsub.f32 0.0, %v2868_v58  ;;  %v1431_v56 = vmul.f32 %v1332_v36, %v2868_v58 }
 0x189   : > { %v1449_v3 = vsub.f32 0.0, %v2880_v0 }
 0x18a   : > { %1388 = vrot.lane.b32.xlu1 %v2861_v54, %s2538_s21 }
 0x18b   : > { %1422 = vrot.lane.b32.xlu0 %v2859_v53, %s2538_s21 }
 0x18e   : > { %1424 = vrot.lane.b32.xlu1 %v2868_v58, %s2538_s21 }
 0x18f   : > { %1378 = vrot.lane.b32.xlu0 %v1374_v57, %s2538_s21 }
 0x192   : > { %1380 = vrot.lane.b32.xlu1 %v1375_v61, %s2538_s21 }
 0x193   : > { %1414 = vrot.lane.b32.xlu0 %v1410_v60, %s2538_s21 }
 0x196   : > { %1416 = vrot.lane.b32.xlu1 %v1411_v1, %s2538_s21 }
 0x197   : > { %1452 = vrot.lane.b32.xlu0 %v1448_v63, %s2538_s21 }
 0x19a   : > { %1454 = vrot.lane.b32.xlu1 %v1449_v3, %s2538_s21 }
 0x19b   : > { %1341 = vrot.lane.b32.xlu0 %v1336_v2, %s2538_s21  ;;  %v1357_v2 = vmul.f32 %v1332_v36, %v2853_v50 }
 0x19e   : > { %1462 = vrot.lane.b32.xlu1 %v2880_v0, %s2538_s21 }
 0x19f   : > { %1460 = vrot.lane.b32.xlu0 %v2873_v59, %s2538_s21  ;;  %s2964_s21 = scalar_lea.sflag [#allocation4], %s481_s26 }
 0x1bf   : > { %v1322_v7 = vpop.f32.mrf.mxu0 }
 0x1c0   : > { %v1323_v8 = vadd.f32 %v1322_v7, %v1121_v5 }
 0x1c1   : > { %v1324_v9 = vpop.f32.mrf.mxu0 }
 0x1c2   : > { %v1325_v10 = vadd.f32 %v1324_v9, %v1125_v6  ;;  %v1468_v9 = vmul.f32 %v1331_v19, %v2873_v59 }
 0x1c3   : > { %v1326_v11 = vpop.f32.mrf.mxu0 }
 0x1c4   : > { %v1948_v12 = vpack.c.bf16 %v1325_v10, %v1323_v8  ;;  %v1327_v13 = vadd.f32 %v1326_v11, %v1121_v5 }
 0x1c5   : > { %v1328_v14 = vpop.f32.mrf.mxu0 }
 0x1c6   : > { %1496 = vst [vmem:[%s2897_s1] sm:$0xff] %v1948_v12  ;;  %v1329_v15 = vadd.f32 %v1328_v14, %v1125_v6  ;;  %v1469_v12 = vmul.f32 %v1332_v36, %v2880_v0 }
 0x1c8   : > { %v1949_v16 = vpack.c.bf16 %v1329_v15, %v1327_v13 }
 0x1ca   : > { %1497 = vst [vmem:[%s2897_s1 + $0x8] sm:$0xff] %v1949_v16 }
 0x1f4   : > { %v1348_v18 = vpop.permute.xlu1 %1347 }
 0x1f5   : > { %v1387_v17 = vpop.permute.xlu0 %1386 }
 0x1f8   : > { %v1350_v22 = vpop.permute.xlu1 %1349 }
 0x1f9   : > { %v1340_v21 = vpop.permute.xlu0 %1339 }
 0x1fa   : > { %v1354_v23 = vsel %vm1353_vm0, %v1340_v21, %v1348_v18 }
 0x1fb   : > { %v1358_v25 = vmul.f32 %v1354_v23, %v2904_v20 }
 0x1fc   : > { %v1389_v28 = vpop.permute.xlu1 %1388 }
 0x1fd   : > { %v1360_v26 = vadd.f32 %v1358_v25, %v1356_v24  ;;  %v1423_v27 = vpop.permute.xlu0 %1422 }
 0x1ff   : > { %v1362_v29 = vmul.f32 0.088388346, %v1360_v26 }
 0x200   : > { %v1425_v32 = vpop.permute.xlu1 %1424 }
 0x201   : > { %v1940_v30 = vpack.c.bf16 %v1362_v29, %v1362_v29  ;;  %v1379_v31 = vpop.permute.xlu0 %1378 }
 0x202   : > { %v1392_v33 = vsel %vm1353_vm0, %v1379_v31, %v1387_v17 }
 0x203   : > { %1372 = vst [vmem:[%s2912_s23] sm:$0xf] %v1940_v30  ;;  %v1396_v35 = vmul.f32 %v1392_v33, %v2904_v20 }
 0x204   : > { %v1381_v40 = vpop.permute.xlu1 %1380 }
 0x205   : > { %v1398_v37 = vadd.f32 %v1396_v35, %v1394_v34  ;;  %v1415_v39 = vpop.permute.xlu0 %1414  ;;  %v1393_v44 = vsel %vm1353_vm0, %v1381_v40, %v1389_v28 }
 0x206   : > { %v1428_v41 = vsel %vm1353_vm0, %v1415_v39, %v1423_v27  ;;  %v1397_v47 = vmul.f32 %v1393_v44, %v1334_v38 }
 0x207   : > { %v1942_v43 = vpack.c.bf16 %v1398_v37, %v1398_v37  ;;  %v1432_v45 = vmul.f32 %v1428_v41, %v2904_v20 }
 0x208   : > { %v1399_v51 = vadd.f32 %v1397_v47, %v1395_v46  ;;  %v1417_v52 = vpop.permute.xlu1 %1416 }
 0x209   : > { %1408 = vst [vmem:[%s2924_s30] sm:$0xf] %v1942_v43  ;;  %v1434_v48 = vadd.f32 %v1432_v45, %v1430_v42  ;;  %v1453_v49 = vpop.permute.xlu0 %1452  ;;  %v1429_v55 = vsel %vm1353_vm0, %v1417_v52, %v1425_v32 }
 0x20a   : > { %v1943_v57 = vpack.c.bf16 %v1399_v51, %v1399_v51  ;;  %v1433_v60 = vmul.f32 %v1429_v55, %v1334_v38 }
 0x20b   : > { %v1436_v53 = vmul.f32 0.088388346, %v1434_v48 }
 0x20c   : > { %1409 = vst [vmem:[%s2924_s30 + $0x8] sm:$0xf] %v1943_v57  ;;  %v1435_v62 = vadd.f32 %v1433_v60, %v1431_v56  ;;  %v1455_v63 = vpop.permute.xlu1 %1454 }
 0x20d   : > { %v1944_v54 = vpack.c.bf16 %v1436_v53, %v1436_v53  ;;  %v1342_v61 = vpop.permute.xlu0 %1341 }
 0x20e   : > { %v1355_v1 = vsel %vm1353_vm0, %v1342_v61, %v1350_v22  ;;  %v1437_v4 = vmul.f32 0.088388346, %v1435_v62 }
 0x20f   : > { %1446 = vst [vmem:[%s2912_s23 + $0x4] sm:$0xf] %v1944_v54  ;;  %v1359_v3 = vmul.f32 %v1355_v1, %v1334_v38 }
 0x210   : > { %v1945_v6 = vpack.c.bf16 %v1437_v4, %v1437_v4  ;;  %v1463_v7 = vpop.permute.xlu1 %1462 }
 0x211   : > { %v1361_v5 = vadd.f32 %v1359_v3, %v1357_v2  ;;  %v1461_v58 = vpop.permute.xlu0 %1460  ;;  %v1467_v10 = vsel %vm1353_vm0, %v1455_v63, %v1463_v7 }
 0x212   : > { %v1466_v8 = vsel %vm1353_vm0, %v1453_v49, %v1461_v58  ;;  %1447 = vst [vmem:[%s2912_s23 + $0xc] sm:$0xf] %v1945_v6  ;;  %v1471_v13 = vmul.f32 %v1467_v10, %v1334_v38 }
 0x213   : > { %v1363_v50 = vmul.f32 0.088388346, %v1361_v5  ;;  %v1470_v11 = vmul.f32 %v1466_v8, %v2904_v20 }
 0x214   : > { %v1473_v59 = vadd.f32 %v1471_v13, %v1469_v12 }
 0x215   : > { %v1941_v14 = vpack.c.bf16 %v1363_v50, %v1363_v50  ;;  %v1472_v15 = vadd.f32 %v1470_v11, %v1468_v9 }
 0x216   : > { %v1947_v0 = vpack.c.bf16 %v1473_v59, %v1473_v59 }
 0x217   : > { %1373 = vst [vmem:[%s2912_s23 + $0x8] sm:$0xf] %v1941_v14  ;;  %v1946_v16 = vpack.c.bf16 %v1472_v15, %v1472_v15 }
 0x218   : > { %2393 = shalt.err (!%p2390_p4)
}
 0x219   : > { %s2394_s26 = scalar_lea.hbm %s2950_s12, 256  ;;  %s2398_s14 = scalar_lea.hbm %s3088_s9, 512 }
 0x21a   : > { %p2395_p3 = scmp.ne.s32.totalorder %s2950_s12, %s2394_s26  ;;  %p2399_p13 = scmp.lt.s32.totalorder %s2950_s12, %s3088_s9 }
 0x21b   : > { %p2400_p9 = scmp.lt.s32.totalorder %s2398_s14, %s2394_s26 }
 0x21c   : > { %p2396_p12 = pnand %p2395_p3, %p3126_p8 }
 0x21d   : > { %p2401_p10 = por %p2400_p9, %p2399_p13 }
 0x21e   : > { %p2397_p6 = pneg %p2396_p12 }
 0x220   : > { %p2402_p7 = pnand %p2401_p10, %p2397_p6 }
 0x222   : > { %2405 = shalt.err (!%p2402_p7)
}
 0x223   : > { %s2540_s29 = smov 128   ;;  %s2541_s19 = smov 8   ;;  %1482 = vst [vmem:[%s2924_s30 + $0x4] sm:$0xf] %v1946_v16  ;;  %1483 = vst [vmem:[%s2924_s30 + $0xc] sm:$0xf] %v1947_v0 }
 0x224   : > { %1971 = dma.vmem_to_hbm [thread:$0]  (%p3126_p8), %s2939_s17, 256, %s2950_s12, %s2964_s21, %s2540_s29, %s2540_s29, %s2541_s19  }
 0x225   : > { %s3127_s23 = sld [smem:[#allocation31_spill]]  ;;  %s3004_s14 = scalar_lea.sflag [#allocation14], %s479_s13 }
 0x226   : > { %s2406_s25 = scalar_lea.vmem %s2952_s27, 256  ;;  %s2542_s16 = smov [#allocation13]  }
 0x227   : > { %p2407_p5 = scmp.ne.s32.totalorder %s2952_s27, %s2406_s25  ;;  %s2410_s17 = sshll.u32 %s2542_s16, 4  ;;  %s2411_s17 = int_to_ptr.vmem [resolvable:$false] %s2410_s17 }
 0x228   : > { %s2412_s1 = scalar_lea.vmem %s2411_s17, 512  ;;  %p2413_p1 = scmp.lt.s32.totalorder %s2952_s27, %s2411_s17 }
 0x229   : > { %p2408_p11 = pnand %p2407_p5, %p3126_p8  ;;  %p2414_p0 = scmp.lt.s32.totalorder %s2412_s1, %s2406_s25 }
 0x22b   : > { %s2999_s22 = scalar_lea.hbm %s3127_s23, %s2936_s15  ;;  %p2409_p2 = pneg %p2408_p11 }
 0x22c   : > { %p2415_p4 = por %p2414_p0, %p2413_p1 }
 0x22e   : > { %p2416_p3 = pnand %p2415_p4, %p2409_p2 }
 0x230   : > { %2419 = shalt.err (!%p2416_p3)
}
 0x231   : > { %s2420_s28 = scalar_lea.hbm %s2960_s0, 256  ;;  %s2424_s15 = scalar_lea.hbm %s3089_s10, 512 }
 0x232   : > { %p2421_p12 = scmp.ne.s32.totalorder %s2960_s0, %s2420_s28  ;;  %p2425_p9 = scmp.lt.s32.totalorder %s2960_s0, %s3089_s10 }
 0x233   : > { %p2426_p10 = scmp.lt.s32.totalorder %s2424_s15, %s2420_s28 }
 0x234   : > { %p2422_p6 = pnand %p2421_p12, %p3126_p8 }
 0x235   : > { %p2427_p7 = por %p2426_p10, %p2425_p9 }
 0x236   : > { %p2423_p13 = pneg %p2422_p6 }
 0x238   : > { %p2428_p5 = pnand %p2427_p7, %p2423_p13 }
 0x23a   : > { %2431 = shalt.err (!%p2428_p5)
}
 0x23b   : > { %1972 = dma.vmem_to_hbm [thread:$0]  (%p3126_p8), %s2952_s27, 256, %s2960_s0, %s3004_s14, %s2540_s29, %s2540_s29, %s2541_s19  }
 0x23c   : > { %s2432_s20 = scalar_lea.vmem %s2992_s24, 256  ;;  %s2543_s26 = smov [#allocation15]  }
 0x23d   : > { %p2433_p11 = scmp.ne.s32.totalorder %s2992_s24, %s2432_s20  ;;  %s2436_s25 = sshll.u32 %s2543_s26, 4  ;;  %s2437_s25 = int_to_ptr.vmem [resolvable:$false] %s2436_s25 }
 0x23e   : > { %s2438_s16 = scalar_lea.vmem %s2437_s25, 512  ;;  %p2439_p0 = scmp.lt.s32.totalorder %s2992_s24, %s2437_s25 }
 0x23f   : > { %p2434_p2 = pnand %p2433_p11, %p3126_p8  ;;  %p2440_p4 = scmp.lt.s32.totalorder %s2438_s16, %s2432_s20 }
 0x241   : > { %p2435_p1 = pneg %p2434_p2  ;;  %p2441_p3 = por %p2440_p4, %p2439_p0 }
 0x243   : > { %p2442_p12 = pnand %p2441_p3, %p2435_p1 }
 0x245   : > { %2445 = shalt.err (!%p2442_p12)
}
 0x246   : > { %s2446_s17 = scalar_lea.hbm %s2999_s22, 256  ;;  %s2450_s1 = scalar_lea.hbm %s3127_s23, 512 }
 0x247   : > { %p2447_p6 = scmp.ne.s32.totalorder %s2999_s22, %s2446_s17  ;;  %p2451_p10 = scmp.lt.s32.totalorder %s2999_s22, %s3127_s23 }
 0x248   : > { %p2452_p7 = scmp.lt.s32.totalorder %s2450_s1, %s2446_s17 }
 0x249   : > { %p2448_p13 = pnand %p2447_p6, %p3126_p8 }
 0x24a   : > { %p2453_p5 = por %p2452_p7, %p2451_p10 }
 0x24b   : > { %p2449_p9 = pneg %p2448_p13 }
 0x24d   : > { %p2454_p11 = pnand %p2453_p5, %p2449_p9 }
 0x24f   : > { %2457 = shalt.err (!%p2454_p11)
}
 0x250   : > { %1973 = dma.vmem_to_hbm [thread:$0]  (%p3126_p8), %s2992_s24, 256, %s2999_s22, %s3004_s14, %s2540_s29, %s2540_s29, %s2541_s19  }
 0x251 PF: > { %s3128_s30 = sld [smem:[#allocation22_spill]] }
 0x252   : > { %s3129_s15 = sld [smem:[#allocation28_spill]] }
 0x253   : > { %s3130_s12 = sld [smem:[#allocation25_spill]] }
 0x257   : > { %s1578_s21 = sand.u32 1, %s3128_s30  }
 0x258   : > { %p3131_p2 = scmp.ne.s32.totalorder %s3129_s15, 0  ;;  %s1579_s20 = scalar_lea.sflag [#allocation4], %s1578_s21 }
 0x259   : > { %p3132_p1 = scmp.ge.s32.totalorder %s3130_s12, 2 }
 0x25b   : > { %p1998_p0 = pnand %p3132_p1, %p3131_p2 }
 0x25d   : > { %p1999_p4 = pneg %p1998_p0 }
 0x25f   : > { %2499 = dma.done.wait (%p1999_p4), %s1579_s20, 256  }
 0x260   : > { %2501 = vsyncadd (%p1999_p4), %s1579_s20, 4294967040  ;;  %s3133_s11 = sadd.s32 4294967294, %s3130_s12  }
 0x261   : > { %s1587_s26 = sand.u32 1, %s3133_s11  }
 0x262   : > { %s1588_s25 = scalar_lea.sflag [#allocation14], %s1587_s26 }
 0x263   : > { %2503 = dma.done.wait (%p1999_p4), %s1588_s25, 512  }
 0x264   : > { %2505 = vsyncadd (%p1999_p4), %s1588_s25, 4294966784  ;;  %s33_s22 = sadd.s32 1, %s3130_s12   ;;  %s3134_s24 = sld [smem:[#allocation23_spill]] }
 0x265   : > { %p30_p8 = scmp.ge.s32.totalorder %s33_s22, 4   ;;  %s3135_s19 = sld [smem:[#allocation27_spill]] }
 0x266   : > { %s3136_s20 = sld [smem:[#allocation24_spill]]  ;;  %s3138_s17 = smov %s2512_s18 }
 0x267   : > { %s3137_s21 = sld [smem:[#allocation26_spill]]  ;;  %32 = sbr.rel (!%p30_p8) target bundleno = 14 (0xe), region = 167 }
 0x26a   : > { %s3139_s18 = smov %s3134_s24 }
 0x26c   :  { %1602 = vsyncpa [#allocation3], 1 }
 0x26d   :  { %1604 = vsyncpa [#allocation3 + $0x1], 1 }
 0x26e   :  { %1605 = vsyncpa [#allocation6], 1 }
 0x26f   :  { %1606 = vsyncpa [#allocation9], 1 }
 0x270   :  { %1607 = vsyncpa [#allocation4], 1 }
 0x271   :  { %1609 = vsyncpa [#allocation4 + $0x1], 1 }
 0x272   :  { %1610 = vsyncpa [#allocation14], 1 }
 0x273   :  { %1612 = vsyncpa [#allocation14 + $0x1], 1 }

</bundles_post_ra>
